<compile_context>
chip_gen: v6e
topology: v6e:2x2x1
jax: 0.10.0
libtpu: 0.0.40
codegen_flags: <defaults>
</compile_context>

<pallas_src>
import math
import functools

import numpy as np
import jax
import jax.numpy as jnp
from jax import lax
from jax.experimental import pallas as pl
from jax.experimental.pallas import tpu as pltpu


def _round_up(v, m):
    return ((v + m - 1) // m) * m


# ---------------------------------------------------------------------------
# in-kernel helper: clamped shift (replication-pad semantics, no concatenates)
# ---------------------------------------------------------------------------
def _cshift(a, d, axis, limit, idx):
    """b[.., i, ..] = a[.., clamp(i + d, 0, limit - 1), ..] along `axis`.

    `a` may be padded beyond `limit` along `axis`; those positions of the
    result are don't-care (they are never read back into the valid region).
    `d` is a static Python int, `idx` is a broadcasted iota along `axis`.
    """
    if d == 0:
        return a
    n = a.shape[axis]
    s = (-d) % n
    rolled = a if s == 0 else pltpu.roll(a, s, axis)
    if d > 0:
        edge = lax.slice_in_dim(a, limit - 1, limit, axis=axis)
        return jnp.where(idx > (limit - 1 - d),
                         jnp.broadcast_to(edge, a.shape), rolled)
    else:
        edge = lax.slice_in_dim(a, 0, 1, axis=axis)
        return jnp.where(idx < (-d),
                         jnp.broadcast_to(edge, a.shape), rolled)


# ---------------------------------------------------------------------------
# the Pallas kernel: full forward for one (H, W) plane
# ---------------------------------------------------------------------------
def _bsws_kernel(x_ref, pred_ref, out_ref, *, H, W,
                 boundary_suppression, boundary_width, boundary_iteration,
                 dilated_smoothing, kernel_size, conv_dilation, g1d):
    out = x_ref[0]                                   # (Hp, Wp) f32
    hp, wp = out.shape

    # hoisted iotas (one per axis) for all clamped shifts
    ridx = lax.broadcasted_iota(jnp.int32, (hp, wp), 0)
    cidx = lax.broadcasted_iota(jnp.int32, (hp, wp), 1)

    def shr(a, d):   # clamped row (sublane) shift
        return _cshift(a, d, 0, H, ridx)

    def shc(a, d):   # clamped column (lane) shift
        return _cshift(a, d, 1, W, cidx)

    if boundary_suppression:
        pred = pred_ref[0]                           # (Hp, Wp) int32 labels

        # ---- find_boundaries: flat morphology (geodesic border == edge clamp)
        # TODO(synk): kornia's non-flat (kernel-value-adding) morphology is
        # version dependent; flat morphology matches the intended semantics.
        up, dn = shr(pred, -1), shr(pred, 1)
        lf, rt = shc(pred, -1), shc(pred, 1)
        dil = jnp.maximum(jnp.maximum(jnp.maximum(up, dn),
                                      jnp.maximum(lf, rt)), pred)
        rmin = jnp.minimum(jnp.minimum(up, dn), pred)         # separable 3x3 min
        ero = jnp.minimum(jnp.minimum(shc(rmin, -1), shc(rmin, 1)), rmin)
        boundaries = (dil != ero).astype(jnp.float32)

        diff = 0
        if boundary_iteration != 0:
            assert boundary_width % boundary_iteration == 0
            diff = boundary_width // boundary_iteration

        # ---- boundary suppression iterations ----
        for it in range(boundary_iteration):
            prev_out = out
            if boundary_width == 0 or it == boundary_iteration - 1:
                r = 0
            else:
                r = boundary_width - diff * it - 1

            # expand_boundaries: separable (2r+1)x(2r+1) max filter
            eb = boundaries
            if r > 0:
                rm = boundaries
                for d in range(1, r + 1):
                    rm = jnp.maximum(rm, jnp.maximum(shr(boundaries, -d),
                                                     shr(boundaries, d)))
                eb = rm
                for d in range(1, r + 1):
                    eb = jnp.maximum(eb, jnp.maximum(shc(rm, -d), shc(rm, d)))

            mask = (eb == 0.0).astype(jnp.float32)   # non-boundary mask

            # first_conv (3x3 all-ones) on ReplicationPad2d(1) inputs, separable
            xm = out * mask
            xr = xm + shr(xm, -1) + shr(xm, 1)
            mr = mask + shr(mask, -1) + shr(mask, 1)
            y = xr + shc(xr, -1) + shc(xr, 1)
            cnt = mr + shc(mr, -1) + shc(mr, 1)      # exact small integers in f32

            avg_y = jnp.where(cnt == 0.0, prev_out, y / jnp.maximum(cnt, 1.0))
            out = jnp.where(mask == 0.0, avg_y, prev_out)

    if dilated_smoothing:
        # second_conv: 7x7 Gaussian (sigma=1), dilation=6, ReplicationPad2d(18).
        # The 2D kernel is an exact outer product of a 1D Gaussian -> separable.
        pad = conv_dilation * (kernel_size // 2)
        sr = jnp.zeros_like(out)
        for k in range(kernel_size):
            sr = sr + g1d[k] * shr(out, k * conv_dilation - pad)
        sm = jnp.zeros_like(out)
        for k in range(kernel_size):
            sm = sm + g1d[k] * shc(sr, k * conv_dilation - pad)
        out = sm

    out_ref[0] = out.astype(out_ref.dtype)


# ---------------------------------------------------------------------------
# wrapper: alignment padding + pallas_call plumbing
# ---------------------------------------------------------------------------
def boundary_suppression_with_smoothing(
        x, prediction, *,
        boundary_suppression=True, boundary_width=4, boundary_iteration=4,
        dilated_smoothing=True, kernel_size=7, dilation=6):
    """x: (N, H, W) float, prediction: (N, H, W) integer label map. Returns (N, H, W) f32."""
    assert x.ndim == 3 and prediction.shape == x.shape
    N, H, W = x.shape

    # Lane/sublane alignment: pad W to a multiple of 128 and H to a multiple of
    # 8.  The padded values can never influence the valid region because all
    # shifts inside the kernel clamp at the true H/W; output is cropped below.
    Hp = _round_up(H, 8)
    Wp = _round_up(W, 128)

    xf = x.astype(jnp.float32)
    pf = prediction.astype(jnp.int32)          # keep labels integer (exact compares)
    if (Hp, Wp) != (H, W):
        pad_cfg = ((0, 0), (0, Hp - H), (0, Wp - W))
        xf = jnp.pad(xf, pad_cfg, mode="edge")
        pf = jnp.pad(pf, pad_cfg, mode="edge")

    # 1D normalised Gaussian (sigma=1, size=kernel_size); the module's 7x7
    # Gaussian is exactly the outer product of this vector with itself.
    sigma = 1.0
    u = np.exp(-((np.arange(kernel_size) - (kernel_size - 1) / 2.0) ** 2)
               / (2.0 * sigma ** 2))
    g1d = tuple(float(v) for v in (u / u.sum()))

    kernel = functools.partial(
        _bsws_kernel, H=H, W=W,
        boundary_suppression=boundary_suppression,
        boundary_width=boundary_width,
        boundary_iteration=boundary_iteration,
        dilated_smoothing=dilated_smoothing,
        kernel_size=kernel_size, conv_dilation=dilation, g1d=g1d)

    # TODO(synk): for very large planes on v7x (64 MiB VMEM, 2 TCs) tile H into
    # row strips with ~(1 + sum(expansion radii + 1) + 18)-row halos via manual
    # DMA (grid=(N, strips)); full-plane blocks are kept here for clarity at
    # typical crop sizes.
    out = pl.pallas_call(
        kernel,
        out_shape=jax.ShapeDtypeStruct((N, Hp, Wp), jnp.float32),
        grid=(N,),
        in_specs=[pl.BlockSpec((1, Hp, Wp), lambda n: (n, 0, 0)),
                  pl.BlockSpec((1, Hp, Wp), lambda n: (n, 0, 0))],
        out_specs=pl.BlockSpec((1, Hp, Wp), lambda n: (n, 0, 0)),
        compiler_params=pltpu.CompilerParams(
            dimension_semantics=("parallel",),
            vmem_limit_bytes=48 * 1024 * 1024),
    )(xf, pf)

    return out[:, :H, :W]


# ---------------------------------------------------------------------------
# NumPy reference (straightforward port of the PyTorch forward) for self-test
# ---------------------------------------------------------------------------
def _ref_gaussian_kernel_2d(size=7, sigma=1.0):
    gk = np.fromfunction(
        lambda a, b: 1.0 / (2.0 * math.pi * sigma ** 2) * math.e ** (
            -1.0 * (((a - (size - 1) / 2.0) ** 2 + (b - (size - 1) / 2.0) ** 2)
                    / (2.0 * sigma ** 2))),
        (size, size))
    return gk / gk.sum()


def _ref_find_boundaries(label):
    H, W = label.shape
    p = np.pad(label, 1, mode="edge")
    dil = np.maximum.reduce([p[1:H + 1, 1:W + 1], p[0:H, 1:W + 1],
                             p[2:H + 2, 1:W + 1], p[1:H + 1, 0:W],
                             p[1:H + 1, 2:W + 2]])
    ero = np.minimum.reduce([p[dy:dy + H, dx:dx + W]
                             for dy in range(3) for dx in range(3)])
    return (dil != ero).astype(np.float64)


def _ref_expand_boundaries(b, r):
    if r == 0:
        return b
    H, W = b.shape
    p = np.pad(b, r, mode="edge")        # flat SE -> identical to geodesic border
    return np.maximum.reduce([p[dy:dy + H, dx:dx + W]
                              for dy in range(2 * r + 1) for dx in range(2 * r + 1)])


def _reference_forward(x, prediction, *, boundary_suppression=True,
                       boundary_width=4, boundary_iteration=4,
                       dilated_smoothing=True, kernel_size=7, dilation=6):
    x = np.asarray(x, np.float64)
    pred = np.asarray(prediction, np.float64)
    N, H, W = x.shape
    gk = _ref_gaussian_kernel_2d(kernel_size, 1.0)
    res = np.empty((N, H, W), np.float64)
    for n in range(N):
        out = x[n]
        if boundary_suppression:
            boundaries = _ref_find_boundaries(pred[n])
            diff = boundary_width // boundary_iteration if boundary_iteration else 0
            for it in range(boundary_iteration):
                prev = out
                if boundary_width == 0 or it == boundary_iteration - 1:
                    r = 0
                else:
                    r = boundary_width - diff * it - 1
                mask = (_ref_expand_boundaries(boundaries, r) == 0).astype(np.float64)
                xp = np.pad(out * mask, 1, mode="edge")
                mp = np.pad(mask, 1, mode="edge")
                y = np.zeros((H, W)); cnt = np.zeros((H, W))
                for dy in range(3):
                    for dx in range(3):
                        y += xp[dy:dy + H, dx:dx + W]
                        cnt += mp[dy:dy + H, dx:dx + W]
                cnt = np.floor(cnt)
                avg = np.where(cnt == 0, prev, y / np.maximum(cnt, 1.0))
                out = np.where(mask == 0, avg, prev)
        if dilated_smoothing:
            pad = dilation * (kernel_size // 2)
            op = np.pad(out, pad, mode="edge")
            sm = np.zeros((H, W))
            for a in range(kernel_size):
                for b in range(kernel_size):
                    sm += gk[a, b] * op[a * dilation:a * dilation + H,
                                        b * dilation:b * dilation + W]
            out = sm
        res[n] = out
    return res.astype(np.float32)


if __name__ == "__main__":
    key = jax.random.PRNGKey(0)
    k1, k2 = jax.random.split(key)

    N, H, W = 2, 16, 16
    # anomaly-score-like input (e.g. max logits) and a predicted class map
    x = jax.random.normal(k1, (N, H, W), dtype=jnp.float32)
    prediction = jax.random.randint(k2, (N, H, W), 0, 5, dtype=jnp.int32)

    out = boundary_suppression_with_smoothing(x, prediction)
    out = jax.block_until_ready(out)

    assert out.shape == (N, H, W), out.shape
    assert out.dtype == jnp.float32
    assert bool(jnp.all(jnp.isfinite(out)))

    ref = _reference_forward(np.asarray(x), np.asarray(prediction))
    np.testing.assert_allclose(np.asarray(out), ref, rtol=1e-4, atol=1e-4)
    print("KERNEL_OK")
</pallas_src>

<mosaic_0001>
module attributes {stable_mosaic.version = 11 : i64} {
  func.func @_bsws_kernel(%arg0: i32, %arg1: memref<1x16x128xf32, #tpu.memory_space<vmem>>, %arg2: memref<1x16x128xi32, #tpu.memory_space<vmem>>, %arg3: memref<1x16x128xf32, #tpu.memory_space<vmem>>) attributes {dimension_semantics = [#tpu.dimension_semantics<parallel>], iteration_bounds = array<i64: 2>, scalar_prefetch = 0 : i64, scratch_operands = 0 : i64, tpu.core_type = #tpu.core_type<tc>, window_params = [{transform_indices = @transform_0, window_bounds = array<i64: 1, 16, 128>}, {transform_indices = @transform_1, window_bounds = array<i64: 1, 16, 128>}, {transform_indices = @transform_2, window_bounds = array<i64: 1, 16, 128>}]} {
    %c0 = arith.constant 0 : index
    %c0_0 = arith.constant 0 : index
    %c0_1 = arith.constant 0 : index
    %0 = vector.load %arg1[%c0, %c0_0, %c0_1] : memref<1x16x128xf32, #tpu.memory_space<vmem>>, vector<1x16x128xf32>
    %1 = vector.shape_cast %0 : vector<1x16x128xf32> to vector<16x128xf32>
    %2 = tpu.iota {dimensions = array<i32: 0>} : vector<16x128xi32>
    %3 = tpu.iota {dimensions = array<i32: 1>} : vector<16x128xi32>
    %c0_2 = arith.constant 0 : index
    %c0_3 = arith.constant 0 : index
    %c0_4 = arith.constant 0 : index
    %4 = vector.load %arg2[%c0_2, %c0_3, %c0_4] : memref<1x16x128xi32, #tpu.memory_space<vmem>>, vector<1x16x128xi32>
    %5 = vector.shape_cast %4 : vector<1x16x128xi32> to vector<16x128xi32>
    %c1_i32 = arith.constant 1 : i32
    %6 = tpu.dynamic_rotate %5 by %c1_i32 dim 0 : vector<16x128xi32>, i32 -> vector<16x128xi32>
    %7 = vector.extract_strided_slice %5 {offsets = [0, 0], sizes = [1, 128], strides = [1, 1]} : vector<16x128xi32> to vector<1x128xi32>
    %c1_i32_5 = arith.constant 1 : i32
    %8 = vector.broadcast %c1_i32_5 : i32 to vector<16x128xi32>
    %9 = arith.cmpi slt, %2, %8 : vector<16x128xi32>
    %10 = vector.shape_cast %7 : vector<1x128xi32> to vector<1x128xi32>
    %11 = vector.broadcast %10 : vector<1x128xi32> to vector<16x128xi32>
    %12 = arith.select %9, %11, %6 : vector<16x128xi1>, vector<16x128xi32>
    %c15_i32 = arith.constant 15 : i32
    %13 = tpu.dynamic_rotate %5 by %c15_i32 dim 0 : vector<16x128xi32>, i32 -> vector<16x128xi32>
    %14 = vector.extract_strided_slice %5 {offsets = [15, 0], sizes = [1, 128], strides = [1, 1]} : vector<16x128xi32> to vector<1x128xi32>
    %c14_i32 = arith.constant 14 : i32
    %15 = vector.broadcast %c14_i32 : i32 to vector<16x128xi32>
    %16 = arith.cmpi sgt, %2, %15 : vector<16x128xi32>
    %17 = vector.shape_cast %14 : vector<1x128xi32> to vector<1x128xi32>
    %18 = vector.broadcast %17 : vector<1x128xi32> to vector<16x128xi32>
    %19 = arith.select %16, %18, %13 : vector<16x128xi1>, vector<16x128xi32>
    %c1_i32_6 = arith.constant 1 : i32
    %20 = tpu.dynamic_rotate %5 by %c1_i32_6 dim 1 : vector<16x128xi32>, i32 -> vector<16x128xi32>
    %21 = vector.extract_strided_slice %5 {offsets = [0, 0], sizes = [16, 1], strides = [1, 1]} : vector<16x128xi32> to vector<16x1xi32>
    %c1_i32_7 = arith.constant 1 : i32
    %22 = vector.broadcast %c1_i32_7 : i32 to vector<16x128xi32>
    %23 = arith.cmpi slt, %3, %22 : vector<16x128xi32>
    %24 = vector.shape_cast %21 : vector<16x1xi32> to vector<16x1xi32>
    %25 = vector.broadcast %24 : vector<16x1xi32> to vector<16x128xi32>
    %26 = arith.select %23, %25, %20 : vector<16x128xi1>, vector<16x128xi32>
    %c127_i32 = arith.constant 127 : i32
    %27 = tpu.dynamic_rotate %5 by %c127_i32 dim 1 : vector<16x128xi32>, i32 -> vector<16x128xi32>
    %28 = vector.extract_strided_slice %5 {offsets = [0, 15], sizes = [16, 1], strides = [1, 1]} : vector<16x128xi32> to vector<16x1xi32>
    %c14_i32_8 = arith.constant 14 : i32
    %29 = vector.broadcast %c14_i32_8 : i32 to vector<16x128xi32>
    %30 = arith.cmpi sgt, %3, %29 : vector<16x128xi32>
    %31 = vector.shape_cast %28 : vector<16x1xi32> to vector<16x1xi32>
    %32 = vector.broadcast %31 : vector<16x1xi32> to vector<16x128xi32>
    %33 = arith.select %30, %32, %27 : vector<16x128xi1>, vector<16x128xi32>
    %34 = arith.maxsi %12, %19 : vector<16x128xi32>
    %35 = arith.maxsi %26, %33 : vector<16x128xi32>
    %36 = arith.maxsi %34, %35 : vector<16x128xi32>
    %37 = arith.maxsi %36, %5 : vector<16x128xi32>
    %38 = arith.minsi %12, %19 : vector<16x128xi32>
    %39 = arith.minsi %38, %5 : vector<16x128xi32>
    %c1_i32_9 = arith.constant 1 : i32
    %40 = tpu.dynamic_rotate %39 by %c1_i32_9 dim 1 : vector<16x128xi32>, i32 -> vector<16x128xi32>
    %41 = vector.extract_strided_slice %39 {offsets = [0, 0], sizes = [16, 1], strides = [1, 1]} : vector<16x128xi32> to vector<16x1xi32>
    %c1_i32_10 = arith.constant 1 : i32
    %42 = vector.broadcast %c1_i32_10 : i32 to vector<16x128xi32>
    %43 = arith.cmpi slt, %3, %42 : vector<16x128xi32>
    %44 = vector.shape_cast %41 : vector<16x1xi32> to vector<16x1xi32>
    %45 = vector.broadcast %44 : vector<16x1xi32> to vector<16x128xi32>
    %46 = arith.select %43, %45, %40 : vector<16x128xi1>, vector<16x128xi32>
    %c127_i32_11 = arith.constant 127 : i32
    %47 = tpu.dynamic_rotate %39 by %c127_i32_11 dim 1 : vector<16x128xi32>, i32 -> vector<16x128xi32>
    %48 = vector.extract_strided_slice %39 {offsets = [0, 15], sizes = [16, 1], strides = [1, 1]} : vector<16x128xi32> to vector<16x1xi32>
    %c14_i32_12 = arith.constant 14 : i32
    %49 = vector.broadcast %c14_i32_12 : i32 to vector<16x128xi32>
    %50 = arith.cmpi sgt, %3, %49 : vector<16x128xi32>
    %51 = vector.shape_cast %48 : vector<16x1xi32> to vector<16x1xi32>
    %52 = vector.broadcast %51 : vector<16x1xi32> to vector<16x128xi32>
    %53 = arith.select %50, %52, %47 : vector<16x128xi1>, vector<16x128xi32>
    %54 = arith.minsi %46, %53 : vector<16x128xi32>
    %55 = arith.minsi %54, %39 : vector<16x128xi32>
    %56 = arith.cmpi ne, %37, %55 : vector<16x128xi32>
    %57 = arith.extui %56 : vector<16x128xi1> to vector<16x128xi32>
    %58 = arith.sitofp %57 : vector<16x128xi32> to vector<16x128xf32>
    %c1_i32_13 = arith.constant 1 : i32
    %59 = tpu.dynamic_rotate %58 by %c1_i32_13 dim 0 : vector<16x128xf32>, i32 -> vector<16x128xf32>
    %60 = vector.extract_strided_slice %58 {offsets = [0, 0], sizes = [1, 128], strides = [1, 1]} : vector<16x128xf32> to vector<1x128xf32>
    %c1_i32_14 = arith.constant 1 : i32
    %61 = vector.broadcast %c1_i32_14 : i32 to vector<16x128xi32>
    %62 = arith.cmpi slt, %2, %61 : vector<16x128xi32>
    %63 = vector.shape_cast %60 : vector<1x128xf32> to vector<1x128xf32>
    %64 = vector.broadcast %63 : vector<1x128xf32> to vector<16x128xf32>
    %65 = arith.select %62, %64, %59 : vector<16x128xi1>, vector<16x128xf32>
    %c15_i32_15 = arith.constant 15 : i32
    %66 = tpu.dynamic_rotate %58 by %c15_i32_15 dim 0 : vector<16x128xf32>, i32 -> vector<16x128xf32>
    %67 = vector.extract_strided_slice %58 {offsets = [15, 0], sizes = [1, 128], strides = [1, 1]} : vector<16x128xf32> to vector<1x128xf32>
    %c14_i32_16 = arith.constant 14 : i32
    %68 = vector.broadcast %c14_i32_16 : i32 to vector<16x128xi32>
    %69 = arith.cmpi sgt, %2, %68 : vector<16x128xi32>
    %70 = vector.shape_cast %67 : vector<1x128xf32> to vector<1x128xf32>
    %71 = vector.broadcast %70 : vector<1x128xf32> to vector<16x128xf32>
    %72 = arith.select %69, %71, %66 : vector<16x128xi1>, vector<16x128xf32>
    %73 = arith.maximumf %65, %72 : vector<16x128xf32>
    %74 = arith.maximumf %58, %73 : vector<16x128xf32>
    %c2_i32 = arith.constant 2 : i32
    %75 = tpu.dynamic_rotate %58 by %c2_i32 dim 0 : vector<16x128xf32>, i32 -> vector<16x128xf32>
    %76 = vector.extract_strided_slice %58 {offsets = [0, 0], sizes = [1, 128], strides = [1, 1]} : vector<16x128xf32> to vector<1x128xf32>
    %c2_i32_17 = arith.constant 2 : i32
    %77 = vector.broadcast %c2_i32_17 : i32 to vector<16x128xi32>
    %78 = arith.cmpi slt, %2, %77 : vector<16x128xi32>
    %79 = vector.shape_cast %76 : vector<1x128xf32> to vector<1x128xf32>
    %80 = vector.broadcast %79 : vector<1x128xf32> to vector<16x128xf32>
    %81 = arith.select %78, %80, %75 : vector<16x128xi1>, vector<16x128xf32>
    %c14_i32_18 = arith.constant 14 : i32
    %82 = tpu.dynamic_rotate %58 by %c14_i32_18 dim 0 : vector<16x128xf32>, i32 -> vector<16x128xf32>
    %83 = vector.extract_strided_slice %58 {offsets = [15, 0], sizes = [1, 128], strides = [1, 1]} : vector<16x128xf32> to vector<1x128xf32>
    %c13_i32 = arith.constant 13 : i32
    %84 = vector.broadcast %c13_i32 : i32 to vector<16x128xi32>
    %85 = arith.cmpi sgt, %2, %84 : vector<16x128xi32>
    %86 = vector.shape_cast %83 : vector<1x128xf32> to vector<1x128xf32>
    %87 = vector.broadcast %86 : vector<1x128xf32> to vector<16x128xf32>
    %88 = arith.select %85, %87, %82 : vector<16x128xi1>, vector<16x128xf32>
    %89 = arith.maximumf %81, %88 : vector<16x128xf32>
    %90 = arith.maximumf %74, %89 : vector<16x128xf32>
    %c3_i32 = arith.constant 3 : i32
    %91 = tpu.dynamic_rotate %58 by %c3_i32 dim 0 : vector<16x128xf32>, i32 -> vector<16x128xf32>
    %92 = vector.extract_strided_slice %58 {offsets = [0, 0], sizes = [1, 128], strides = [1, 1]} : vector<16x128xf32> to vector<1x128xf32>
    %c3_i32_19 = arith.constant 3 : i32
    %93 = vector.broadcast %c3_i32_19 : i32 to vector<16x128xi32>
    %94 = arith.cmpi slt, %2, %93 : vector<16x128xi32>
    %95 = vector.shape_cast %92 : vector<1x128xf32> to vector<1x128xf32>
    %96 = vector.broadcast %95 : vector<1x128xf32> to vector<16x128xf32>
    %97 = arith.select %94, %96, %91 : vector<16x128xi1>, vector<16x128xf32>
    %c13_i32_20 = arith.constant 13 : i32
    %98 = tpu.dynamic_rotate %58 by %c13_i32_20 dim 0 : vector<16x128xf32>, i32 -> vector<16x128xf32>
    %99 = vector.extract_strided_slice %58 {offsets = [15, 0], sizes = [1, 128], strides = [1, 1]} : vector<16x128xf32> to vector<1x128xf32>
    %c12_i32 = arith.constant 12 : i32
    %100 = vector.broadcast %c12_i32 : i32 to vector<16x128xi32>
    %101 = arith.cmpi sgt, %2, %100 : vector<16x128xi32>
    %102 = vector.shape_cast %99 : vector<1x128xf32> to vector<1x128xf32>
    %103 = vector.broadcast %102 : vector<1x128xf32> to vector<16x128xf32>
    %104 = arith.select %101, %103, %98 : vector<16x128xi1>, vector<16x128xf32>
    %105 = arith.maximumf %97, %104 : vector<16x128xf32>
    %106 = arith.maximumf %90, %105 : vector<16x128xf32>
    %c1_i32_21 = arith.constant 1 : i32
    %107 = tpu.dynamic_rotate %106 by %c1_i32_21 dim 1 : vector<16x128xf32>, i32 -> vector<16x128xf32>
    %108 = vector.extract_strided_slice %106 {offsets = [0, 0], sizes = [16, 1], strides = [1, 1]} : vector<16x128xf32> to vector<16x1xf32>
    %c1_i32_22 = arith.constant 1 : i32
    %109 = vector.broadcast %c1_i32_22 : i32 to vector<16x128xi32>
    %110 = arith.cmpi slt, %3, %109 : vector<16x128xi32>
    %111 = vector.shape_cast %108 : vector<16x1xf32> to vector<16x1xf32>
    %112 = vector.broadcast %111 : vector<16x1xf32> to vector<16x128xf32>
    %113 = arith.select %110, %112, %107 : vector<16x128xi1>, vector<16x128xf32>
    %c127_i32_23 = arith.constant 127 : i32
    %114 = tpu.dynamic_rotate %106 by %c127_i32_23 dim 1 : vector<16x128xf32>, i32 -> vector<16x128xf32>
    %115 = vector.extract_strided_slice %106 {offsets = [0, 15], sizes = [16, 1], strides = [1, 1]} : vector<16x128xf32> to vector<16x1xf32>
    %c14_i32_24 = arith.constant 14 : i32
    %116 = vector.broadcast %c14_i32_24 : i32 to vector<16x128xi32>
    %117 = arith.cmpi sgt, %3, %116 : vector<16x128xi32>
    %118 = vector.shape_cast %115 : vector<16x1xf32> to vector<16x1xf32>
    %119 = vector.broadcast %118 : vector<16x1xf32> to vector<16x128xf32>
    %120 = arith.select %117, %119, %114 : vector<16x128xi1>, vector<16x128xf32>
    %121 = arith.maximumf %113, %120 : vector<16x128xf32>
    %122 = arith.maximumf %106, %121 : vector<16x128xf32>
    %c2_i32_25 = arith.constant 2 : i32
    %123 = tpu.dynamic_rotate %106 by %c2_i32_25 dim 1 : vector<16x128xf32>, i32 -> vector<16x128xf32>
    %124 = vector.extract_strided_slice %106 {offsets = [0, 0], sizes = [16, 1], strides = [1, 1]} : vector<16x128xf32> to vector<16x1xf32>
    %c2_i32_26 = arith.constant 2 : i32
    %125 = vector.broadcast %c2_i32_26 : i32 to vector<16x128xi32>
    %126 = arith.cmpi slt, %3, %125 : vector<16x128xi32>
    %127 = vector.shape_cast %124 : vector<16x1xf32> to vector<16x1xf32>
    %128 = vector.broadcast %127 : vector<16x1xf32> to vector<16x128xf32>
    %129 = arith.select %126, %128, %123 : vector<16x128xi1>, vector<16x128xf32>
    %c126_i32 = arith.constant 126 : i32
    %130 = tpu.dynamic_rotate %106 by %c126_i32 dim 1 : vector<16x128xf32>, i32 -> vector<16x128xf32>
    %131 = vector.extract_strided_slice %106 {offsets = [0, 15], sizes = [16, 1], strides = [1, 1]} : vector<16x128xf32> to vector<16x1xf32>
    %c13_i32_27 = arith.constant 13 : i32
    %132 = vector.broadcast %c13_i32_27 : i32 to vector<16x128xi32>
    %133 = arith.cmpi sgt, %3, %132 : vector<16x128xi32>
    %134 = vector.shape_cast %131 : vector<16x1xf32> to vector<16x1xf32>
    %135 = vector.broadcast %134 : vector<16x1xf32> to vector<16x128xf32>
    %136 = arith.select %133, %135, %130 : vector<16x128xi1>, vector<16x128xf32>
    %137 = arith.maximumf %129, %136 : vector<16x128xf32>
    %138 = arith.maximumf %122, %137 : vector<16x128xf32>
    %c3_i32_28 = arith.constant 3 : i32
    %139 = tpu.dynamic_rotate %106 by %c3_i32_28 dim 1 : vector<16x128xf32>, i32 -> vector<16x128xf32>
    %140 = vector.extract_strided_slice %106 {offsets = [0, 0], sizes = [16, 1], strides = [1, 1]} : vector<16x128xf32> to vector<16x1xf32>
    %c3_i32_29 = arith.constant 3 : i32
    %141 = vector.broadcast %c3_i32_29 : i32 to vector<16x128xi32>
    %142 = arith.cmpi slt, %3, %141 : vector<16x128xi32>
    %143 = vector.shape_cast %140 : vector<16x1xf32> to vector<16x1xf32>
    %144 = vector.broadcast %143 : vector<16x1xf32> to vector<16x128xf32>
    %145 = arith.select %142, %144, %139 : vector<16x128xi1>, vector<16x128xf32>
    %c125_i32 = arith.constant 125 : i32
    %146 = tpu.dynamic_rotate %106 by %c125_i32 dim 1 : vector<16x128xf32>, i32 -> vector<16x128xf32>
    %147 = vector.extract_strided_slice %106 {offsets = [0, 15], sizes = [16, 1], strides = [1, 1]} : vector<16x128xf32> to vector<16x1xf32>
    %c12_i32_30 = arith.constant 12 : i32
    %148 = vector.broadcast %c12_i32_30 : i32 to vector<16x128xi32>
    %149 = arith.cmpi sgt, %3, %148 : vector<16x128xi32>
    %150 = vector.shape_cast %147 : vector<16x1xf32> to vector<16x1xf32>
    %151 = vector.broadcast %150 : vector<16x1xf32> to vector<16x128xf32>
    %152 = arith.select %149, %151, %146 : vector<16x128xi1>, vector<16x128xf32>
    %153 = arith.maximumf %145, %152 : vector<16x128xf32>
    %154 = arith.maximumf %138, %153 : vector<16x128xf32>
    %cst = arith.constant 0.000000e+00 : f32
    %155 = vector.broadcast %cst : f32 to vector<16x128xf32>
    %156 = arith.cmpf oeq, %154, %155 : vector<16x128xf32>
    %157 = arith.extui %156 : vector<16x128xi1> to vector<16x128xi32>
    %158 = arith.sitofp %157 : vector<16x128xi32> to vector<16x128xf32>
    %159 = arith.mulf %1, %158 : vector<16x128xf32>
    %c1_i32_31 = arith.constant 1 : i32
    %160 = tpu.dynamic_rotate %159 by %c1_i32_31 dim 0 : vector<16x128xf32>, i32 -> vector<16x128xf32>
    %161 = vector.extract_strided_slice %159 {offsets = [0, 0], sizes = [1, 128], strides = [1, 1]} : vector<16x128xf32> to vector<1x128xf32>
    %c1_i32_32 = arith.constant 1 : i32
    %162 = vector.broadcast %c1_i32_32 : i32 to vector<16x128xi32>
    %163 = arith.cmpi slt, %2, %162 : vector<16x128xi32>
    %164 = vector.shape_cast %161 : vector<1x128xf32> to vector<1x128xf32>
    %165 = vector.broadcast %164 : vector<1x128xf32> to vector<16x128xf32>
    %166 = arith.select %163, %165, %160 : vector<16x128xi1>, vector<16x128xf32>
    %167 = arith.addf %159, %166 : vector<16x128xf32>
    %c15_i32_33 = arith.constant 15 : i32
    %168 = tpu.dynamic_rotate %159 by %c15_i32_33 dim 0 : vector<16x128xf32>, i32 -> vector<16x128xf32>
    %169 = vector.extract_strided_slice %159 {offsets = [15, 0], sizes = [1, 128], strides = [1, 1]} : vector<16x128xf32> to vector<1x128xf32>
    %c14_i32_34 = arith.constant 14 : i32
    %170 = vector.broadcast %c14_i32_34 : i32 to vector<16x128xi32>
    %171 = arith.cmpi sgt, %2, %170 : vector<16x128xi32>
    %172 = vector.shape_cast %169 : vector<1x128xf32> to vector<1x128xf32>
    %173 = vector.broadcast %172 : vector<1x128xf32> to vector<16x128xf32>
    %174 = arith.select %171, %173, %168 : vector<16x128xi1>, vector<16x128xf32>
    %175 = arith.addf %167, %174 : vector<16x128xf32>
    %c1_i32_35 = arith.constant 1 : i32
    %176 = tpu.dynamic_rotate %158 by %c1_i32_35 dim 0 : vector<16x128xf32>, i32 -> vector<16x128xf32>
    %177 = vector.extract_strided_slice %158 {offsets = [0, 0], sizes = [1, 128], strides = [1, 1]} : vector<16x128xf32> to vector<1x128xf32>
    %c1_i32_36 = arith.constant 1 : i32
    %178 = vector.broadcast %c1_i32_36 : i32 to vector<16x128xi32>
    %179 = arith.cmpi slt, %2, %178 : vector<16x128xi32>
    %180 = vector.shape_cast %177 : vector<1x128xf32> to vector<1x128xf32>
    %181 = vector.broadcast %180 : vector<1x128xf32> to vector<16x128xf32>
    %182 = arith.select %179, %181, %176 : vector<16x128xi1>, vector<16x128xf32>
    %183 = arith.addf %158, %182 : vector<16x128xf32>
    %c15_i32_37 = arith.constant 15 : i32
    %184 = tpu.dynamic_rotate %158 by %c15_i32_37 dim 0 : vector<16x128xf32>, i32 -> vector<16x128xf32>
    %185 = vector.extract_strided_slice %158 {offsets = [15, 0], sizes = [1, 128], strides = [1, 1]} : vector<16x128xf32> to vector<1x128xf32>
    %c14_i32_38 = arith.constant 14 : i32
    %186 = vector.broadcast %c14_i32_38 : i32 to vector<16x128xi32>
    %187 = arith.cmpi sgt, %2, %186 : vector<16x128xi32>
    %188 = vector.shape_cast %185 : vector<1x128xf32> to vector<1x128xf32>
    %189 = vector.broadcast %188 : vector<1x128xf32> to vector<16x128xf32>
    %190 = arith.select %187, %189, %184 : vector<16x128xi1>, vector<16x128xf32>
    %191 = arith.addf %183, %190 : vector<16x128xf32>
    %c1_i32_39 = arith.constant 1 : i32
    %192 = tpu.dynamic_rotate %175 by %c1_i32_39 dim 1 : vector<16x128xf32>, i32 -> vector<16x128xf32>
    %193 = vector.extract_strided_slice %175 {offsets = [0, 0], sizes = [16, 1], strides = [1, 1]} : vector<16x128xf32> to vector<16x1xf32>
    %c1_i32_40 = arith.constant 1 : i32
    %194 = vector.broadcast %c1_i32_40 : i32 to vector<16x128xi32>
    %195 = arith.cmpi slt, %3, %194 : vector<16x128xi32>
    %196 = vector.shape_cast %193 : vector<16x1xf32> to vector<16x1xf32>
    %197 = vector.broadcast %196 : vector<16x1xf32> to vector<16x128xf32>
    %198 = arith.select %195, %197, %192 : vector<16x128xi1>, vector<16x128xf32>
    %199 = arith.addf %175, %198 : vector<16x128xf32>
    %c127_i32_41 = arith.constant 127 : i32
    %200 = tpu.dynamic_rotate %175 by %c127_i32_41 dim 1 : vector<16x128xf32>, i32 -> vector<16x128xf32>
    %201 = vector.extract_strided_slice %175 {offsets = [0, 15], sizes = [16, 1], strides = [1, 1]} : vector<16x128xf32> to vector<16x1xf32>
    %c14_i32_42 = arith.constant 14 : i32
    %202 = vector.broadcast %c14_i32_42 : i32 to vector<16x128xi32>
    %203 = arith.cmpi sgt, %3, %202 : vector<16x128xi32>
    %204 = vector.shape_cast %201 : vector<16x1xf32> to vector<16x1xf32>
    %205 = vector.broadcast %204 : vector<16x1xf32> to vector<16x128xf32>
    %206 = arith.select %203, %205, %200 : vector<16x128xi1>, vector<16x128xf32>
    %207 = arith.addf %199, %206 : vector<16x128xf32>
    %c1_i32_43 = arith.constant 1 : i32
    %208 = tpu.dynamic_rotate %191 by %c1_i32_43 dim 1 : vector<16x128xf32>, i32 -> vector<16x128xf32>
    %209 = vector.extract_strided_slice %191 {offsets = [0, 0], sizes = [16, 1], strides = [1, 1]} : vector<16x128xf32> to vector<16x1xf32>
    %c1_i32_44 = arith.constant 1 : i32
    %210 = vector.broadcast %c1_i32_44 : i32 to vector<16x128xi32>
    %211 = arith.cmpi slt, %3, %210 : vector<16x128xi32>
    %212 = vector.shape_cast %209 : vector<16x1xf32> to vector<16x1xf32>
    %213 = vector.broadcast %212 : vector<16x1xf32> to vector<16x128xf32>
    %214 = arith.select %211, %213, %208 : vector<16x128xi1>, vector<16x128xf32>
    %215 = arith.addf %191, %214 : vector<16x128xf32>
    %c127_i32_45 = arith.constant 127 : i32
    %216 = tpu.dynamic_rotate %191 by %c127_i32_45 dim 1 : vector<16x128xf32>, i32 -> vector<16x128xf32>
    %217 = vector.extract_strided_slice %191 {offsets = [0, 15], sizes = [16, 1], strides = [1, 1]} : vector<16x128xf32> to vector<16x1xf32>
    %c14_i32_46 = arith.constant 14 : i32
    %218 = vector.broadcast %c14_i32_46 : i32 to vector<16x128xi32>
    %219 = arith.cmpi sgt, %3, %218 : vector<16x128xi32>
    %220 = vector.shape_cast %217 : vector<16x1xf32> to vector<16x1xf32>
    %221 = vector.broadcast %220 : vector<16x1xf32> to vector<16x128xf32>
    %222 = arith.select %219, %221, %216 : vector<16x128xi1>, vector<16x128xf32>
    %223 = arith.addf %215, %222 : vector<16x128xf32>
    %cst_47 = arith.constant 0.000000e+00 : f32
    %224 = vector.broadcast %cst_47 : f32 to vector<16x128xf32>
    %225 = arith.cmpf oeq, %223, %224 : vector<16x128xf32>
    %cst_48 = arith.constant 1.000000e+00 : f32
    %226 = vector.broadcast %cst_48 : f32 to vector<16x128xf32>
    %227 = arith.maximumf %223, %226 : vector<16x128xf32>
    %228 = arith.divf %207, %227 : vector<16x128xf32>
    %229 = arith.select %225, %1, %228 : vector<16x128xi1>, vector<16x128xf32>
    %cst_49 = arith.constant 0.000000e+00 : f32
    %230 = vector.broadcast %cst_49 : f32 to vector<16x128xf32>
    %231 = arith.cmpf oeq, %158, %230 : vector<16x128xf32>
    %232 = arith.select %231, %229, %1 : vector<16x128xi1>, vector<16x128xf32>
    %c1_i32_50 = arith.constant 1 : i32
    %233 = tpu.dynamic_rotate %58 by %c1_i32_50 dim 0 : vector<16x128xf32>, i32 -> vector<16x128xf32>
    %234 = vector.extract_strided_slice %58 {offsets = [0, 0], sizes = [1, 128], strides = [1, 1]} : vector<16x128xf32> to vector<1x128xf32>
    %c1_i32_51 = arith.constant 1 : i32
    %235 = vector.broadcast %c1_i32_51 : i32 to vector<16x128xi32>
    %236 = arith.cmpi slt, %2, %235 : vector<16x128xi32>
    %237 = vector.shape_cast %234 : vector<1x128xf32> to vector<1x128xf32>
    %238 = vector.broadcast %237 : vector<1x128xf32> to vector<16x128xf32>
    %239 = arith.select %236, %238, %233 : vector<16x128xi1>, vector<16x128xf32>
    %c15_i32_52 = arith.constant 15 : i32
    %240 = tpu.dynamic_rotate %58 by %c15_i32_52 dim 0 : vector<16x128xf32>, i32 -> vector<16x128xf32>
    %241 = vector.extract_strided_slice %58 {offsets = [15, 0], sizes = [1, 128], strides = [1, 1]} : vector<16x128xf32> to vector<1x128xf32>
    %c14_i32_53 = arith.constant 14 : i32
    %242 = vector.broadcast %c14_i32_53 : i32 to vector<16x128xi32>
    %243 = arith.cmpi sgt, %2, %242 : vector<16x128xi32>
    %244 = vector.shape_cast %241 : vector<1x128xf32> to vector<1x128xf32>
    %245 = vector.broadcast %244 : vector<1x128xf32> to vector<16x128xf32>
    %246 = arith.select %243, %245, %240 : vector<16x128xi1>, vector<16x128xf32>
    %247 = arith.maximumf %239, %246 : vector<16x128xf32>
    %248 = arith.maximumf %58, %247 : vector<16x128xf32>
    %c2_i32_54 = arith.constant 2 : i32
    %249 = tpu.dynamic_rotate %58 by %c2_i32_54 dim 0 : vector<16x128xf32>, i32 -> vector<16x128xf32>
    %250 = vector.extract_strided_slice %58 {offsets = [0, 0], sizes = [1, 128], strides = [1, 1]} : vector<16x128xf32> to vector<1x128xf32>
    %c2_i32_55 = arith.constant 2 : i32
    %251 = vector.broadcast %c2_i32_55 : i32 to vector<16x128xi32>
    %252 = arith.cmpi slt, %2, %251 : vector<16x128xi32>
    %253 = vector.shape_cast %250 : vector<1x128xf32> to vector<1x128xf32>
    %254 = vector.broadcast %253 : vector<1x128xf32> to vector<16x128xf32>
    %255 = arith.select %252, %254, %249 : vector<16x128xi1>, vector<16x128xf32>
    %c14_i32_56 = arith.constant 14 : i32
    %256 = tpu.dynamic_rotate %58 by %c14_i32_56 dim 0 : vector<16x128xf32>, i32 -> vector<16x128xf32>
    %257 = vector.extract_strided_slice %58 {offsets = [15, 0], sizes = [1, 128], strides = [1, 1]} : vector<16x128xf32> to vector<1x128xf32>
    %c13_i32_57 = arith.constant 13 : i32
    %258 = vector.broadcast %c13_i32_57 : i32 to vector<16x128xi32>
    %259 = arith.cmpi sgt, %2, %258 : vector<16x128xi32>
    %260 = vector.shape_cast %257 : vector<1x128xf32> to vector<1x128xf32>
    %261 = vector.broadcast %260 : vector<1x128xf32> to vector<16x128xf32>
    %262 = arith.select %259, %261, %256 : vector<16x128xi1>, vector<16x128xf32>
    %263 = arith.maximumf %255, %262 : vector<16x128xf32>
    %264 = arith.maximumf %248, %263 : vector<16x128xf32>
    %c1_i32_58 = arith.constant 1 : i32
    %265 = tpu.dynamic_rotate %264 by %c1_i32_58 dim 1 : vector<16x128xf32>, i32 -> vector<16x128xf32>
    %266 = vector.extract_strided_slice %264 {offsets = [0, 0], sizes = [16, 1], strides = [1, 1]} : vector<16x128xf32> to vector<16x1xf32>
    %c1_i32_59 = arith.constant 1 : i32
    %267 = vector.broadcast %c1_i32_59 : i32 to vector<16x128xi32>
    %268 = arith.cmpi slt, %3, %267 : vector<16x128xi32>
    %269 = vector.shape_cast %266 : vector<16x1xf32> to vector<16x1xf32>
    %270 = vector.broadcast %269 : vector<16x1xf32> to vector<16x128xf32>
    %271 = arith.select %268, %270, %265 : vector<16x128xi1>, vector<16x128xf32>
    %c127_i32_60 = arith.constant 127 : i32
    %272 = tpu.dynamic_rotate %264 by %c127_i32_60 dim 1 : vector<16x128xf32>, i32 -> vector<16x128xf32>
    %273 = vector.extract_strided_slice %264 {offsets = [0, 15], sizes = [16, 1], strides = [1, 1]} : vector<16x128xf32> to vector<16x1xf32>
    %c14_i32_61 = arith.constant 14 : i32
    %274 = vector.broadcast %c14_i32_61 : i32 to vector<16x128xi32>
    %275 = arith.cmpi sgt, %3, %274 : vector<16x128xi32>
    %276 = vector.shape_cast %273 : vector<16x1xf32> to vector<16x1xf32>
    %277 = vector.broadcast %276 : vector<16x1xf32> to vector<16x128xf32>
    %278 = arith.select %275, %277, %272 : vector<16x128xi1>, vector<16x128xf32>
    %279 = arith.maximumf %271, %278 : vector<16x128xf32>
    %280 = arith.maximumf %264, %279 : vector<16x128xf32>
    %c2_i32_62 = arith.constant 2 : i32
    %281 = tpu.dynamic_rotate %264 by %c2_i32_62 dim 1 : vector<16x128xf32>, i32 -> vector<16x128xf32>
    %282 = vector.extract_strided_slice %264 {offsets = [0, 0], sizes = [16, 1], strides = [1, 1]} : vector<16x128xf32> to vector<16x1xf32>
    %c2_i32_63 = arith.constant 2 : i32
    %283 = vector.broadcast %c2_i32_63 : i32 to vector<16x128xi32>
    %284 = arith.cmpi slt, %3, %283 : vector<16x128xi32>
    %285 = vector.shape_cast %282 : vector<16x1xf32> to vector<16x1xf32>
    %286 = vector.broadcast %285 : vector<16x1xf32> to vector<16x128xf32>
    %287 = arith.select %284, %286, %281 : vector<16x128xi1>, vector<16x128xf32>
    %c126_i32_64 = arith.constant 126 : i32
    %288 = tpu.dynamic_rotate %264 by %c126_i32_64 dim 1 : vector<16x128xf32>, i32 -> vector<16x128xf32>
    %289 = vector.extract_strided_slice %264 {offsets = [0, 15], sizes = [16, 1], strides = [1, 1]} : vector<16x128xf32> to vector<16x1xf32>
    %c13_i32_65 = arith.constant 13 : i32
    %290 = vector.broadcast %c13_i32_65 : i32 to vector<16x128xi32>
    %291 = arith.cmpi sgt, %3, %290 : vector<16x128xi32>
    %292 = vector.shape_cast %289 : vector<16x1xf32> to vector<16x1xf32>
    %293 = vector.broadcast %292 : vector<16x1xf32> to vector<16x128xf32>
    %294 = arith.select %291, %293, %288 : vector<16x128xi1>, vector<16x128xf32>
    %295 = arith.maximumf %287, %294 : vector<16x128xf32>
    %296 = arith.maximumf %280, %295 : vector<16x128xf32>
    %cst_66 = arith.constant 0.000000e+00 : f32
    %297 = vector.broadcast %cst_66 : f32 to vector<16x128xf32>
    %298 = arith.cmpf oeq, %296, %297 : vector<16x128xf32>
    %299 = arith.extui %298 : vector<16x128xi1> to vector<16x128xi32>
    %300 = arith.sitofp %299 : vector<16x128xi32> to vector<16x128xf32>
    %301 = arith.mulf %232, %300 : vector<16x128xf32>
    %c1_i32_67 = arith.constant 1 : i32
    %302 = tpu.dynamic_rotate %301 by %c1_i32_67 dim 0 : vector<16x128xf32>, i32 -> vector<16x128xf32>
    %303 = vector.extract_strided_slice %301 {offsets = [0, 0], sizes = [1, 128], strides = [1, 1]} : vector<16x128xf32> to vector<1x128xf32>
    %c1_i32_68 = arith.constant 1 : i32
    %304 = vector.broadcast %c1_i32_68 : i32 to vector<16x128xi32>
    %305 = arith.cmpi slt, %2, %304 : vector<16x128xi32>
    %306 = vector.shape_cast %303 : vector<1x128xf32> to vector<1x128xf32>
    %307 = vector.broadcast %306 : vector<1x128xf32> to vector<16x128xf32>
    %308 = arith.select %305, %307, %302 : vector<16x128xi1>, vector<16x128xf32>
    %309 = arith.addf %301, %308 : vector<16x128xf32>
    %c15_i32_69 = arith.constant 15 : i32
    %310 = tpu.dynamic_rotate %301 by %c15_i32_69 dim 0 : vector<16x128xf32>, i32 -> vector<16x128xf32>
    %311 = vector.extract_strided_slice %301 {offsets = [15, 0], sizes = [1, 128], strides = [1, 1]} : vector<16x128xf32> to vector<1x128xf32>
    %c14_i32_70 = arith.constant 14 : i32
    %312 = vector.broadcast %c14_i32_70 : i32 to vector<16x128xi32>
    %313 = arith.cmpi sgt, %2, %312 : vector<16x128xi32>
    %314 = vector.shape_cast %311 : vector<1x128xf32> to vector<1x128xf32>
    %315 = vector.broadcast %314 : vector<1x128xf32> to vector<16x128xf32>
    %316 = arith.select %313, %315, %310 : vector<16x128xi1>, vector<16x128xf32>
    %317 = arith.addf %309, %316 : vector<16x128xf32>
    %c1_i32_71 = arith.constant 1 : i32
    %318 = tpu.dynamic_rotate %300 by %c1_i32_71 dim 0 : vector<16x128xf32>, i32 -> vector<16x128xf32>
    %319 = vector.extract_strided_slice %300 {offsets = [0, 0], sizes = [1, 128], strides = [1, 1]} : vector<16x128xf32> to vector<1x128xf32>
    %c1_i32_72 = arith.constant 1 : i32
    %320 = vector.broadcast %c1_i32_72 : i32 to vector<16x128xi32>
    %321 = arith.cmpi slt, %2, %320 : vector<16x128xi32>
    %322 = vector.shape_cast %319 : vector<1x128xf32> to vector<1x128xf32>
    %323 = vector.broadcast %322 : vector<1x128xf32> to vector<16x128xf32>
    %324 = arith.select %321, %323, %318 : vector<16x128xi1>, vector<16x128xf32>
    %325 = arith.addf %300, %324 : vector<16x128xf32>
    %c15_i32_73 = arith.constant 15 : i32
    %326 = tpu.dynamic_rotate %300 by %c15_i32_73 dim 0 : vector<16x128xf32>, i32 -> vector<16x128xf32>
    %327 = vector.extract_strided_slice %300 {offsets = [15, 0], sizes = [1, 128], strides = [1, 1]} : vector<16x128xf32> to vector<1x128xf32>
    %c14_i32_74 = arith.constant 14 : i32
    %328 = vector.broadcast %c14_i32_74 : i32 to vector<16x128xi32>
    %329 = arith.cmpi sgt, %2, %328 : vector<16x128xi32>
    %330 = vector.shape_cast %327 : vector<1x128xf32> to vector<1x128xf32>
    %331 = vector.broadcast %330 : vector<1x128xf32> to vector<16x128xf32>
    %332 = arith.select %329, %331, %326 : vector<16x128xi1>, vector<16x128xf32>
    %333 = arith.addf %325, %332 : vector<16x128xf32>
    %c1_i32_75 = arith.constant 1 : i32
    %334 = tpu.dynamic_rotate %317 by %c1_i32_75 dim 1 : vector<16x128xf32>, i32 -> vector<16x128xf32>
    %335 = vector.extract_strided_slice %317 {offsets = [0, 0], sizes = [16, 1], strides = [1, 1]} : vector<16x128xf32> to vector<16x1xf32>
    %c1_i32_76 = arith.constant 1 : i32
    %336 = vector.broadcast %c1_i32_76 : i32 to vector<16x128xi32>
    %337 = arith.cmpi slt, %3, %336 : vector<16x128xi32>
    %338 = vector.shape_cast %335 : vector<16x1xf32> to vector<16x1xf32>
    %339 = vector.broadcast %338 : vector<16x1xf32> to vector<16x128xf32>
    %340 = arith.select %337, %339, %334 : vector<16x128xi1>, vector<16x128xf32>
    %341 = arith.addf %317, %340 : vector<16x128xf32>
    %c127_i32_77 = arith.constant 127 : i32
    %342 = tpu.dynamic_rotate %317 by %c127_i32_77 dim 1 : vector<16x128xf32>, i32 -> vector<16x128xf32>
    %343 = vector.extract_strided_slice %317 {offsets = [0, 15], sizes = [16, 1], strides = [1, 1]} : vector<16x128xf32> to vector<16x1xf32>
    %c14_i32_78 = arith.constant 14 : i32
    %344 = vector.broadcast %c14_i32_78 : i32 to vector<16x128xi32>
    %345 = arith.cmpi sgt, %3, %344 : vector<16x128xi32>
    %346 = vector.shape_cast %343 : vector<16x1xf32> to vector<16x1xf32>
    %347 = vector.broadcast %346 : vector<16x1xf32> to vector<16x128xf32>
    %348 = arith.select %345, %347, %342 : vector<16x128xi1>, vector<16x128xf32>
    %349 = arith.addf %341, %348 : vector<16x128xf32>
    %c1_i32_79 = arith.constant 1 : i32
    %350 = tpu.dynamic_rotate %333 by %c1_i32_79 dim 1 : vector<16x128xf32>, i32 -> vector<16x128xf32>
    %351 = vector.extract_strided_slice %333 {offsets = [0, 0], sizes = [16, 1], strides = [1, 1]} : vector<16x128xf32> to vector<16x1xf32>
    %c1_i32_80 = arith.constant 1 : i32
    %352 = vector.broadcast %c1_i32_80 : i32 to vector<16x128xi32>
    %353 = arith.cmpi slt, %3, %352 : vector<16x128xi32>
    %354 = vector.shape_cast %351 : vector<16x1xf32> to vector<16x1xf32>
    %355 = vector.broadcast %354 : vector<16x1xf32> to vector<16x128xf32>
    %356 = arith.select %353, %355, %350 : vector<16x128xi1>, vector<16x128xf32>
    %357 = arith.addf %333, %356 : vector<16x128xf32>
    %c127_i32_81 = arith.constant 127 : i32
    %358 = tpu.dynamic_rotate %333 by %c127_i32_81 dim 1 : vector<16x128xf32>, i32 -> vector<16x128xf32>
    %359 = vector.extract_strided_slice %333 {offsets = [0, 15], sizes = [16, 1], strides = [1, 1]} : vector<16x128xf32> to vector<16x1xf32>
    %c14_i32_82 = arith.constant 14 : i32
    %360 = vector.broadcast %c14_i32_82 : i32 to vector<16x128xi32>
    %361 = arith.cmpi sgt, %3, %360 : vector<16x128xi32>
    %362 = vector.shape_cast %359 : vector<16x1xf32> to vector<16x1xf32>
    %363 = vector.broadcast %362 : vector<16x1xf32> to vector<16x128xf32>
    %364 = arith.select %361, %363, %358 : vector<16x128xi1>, vector<16x128xf32>
    %365 = arith.addf %357, %364 : vector<16x128xf32>
    %cst_83 = arith.constant 0.000000e+00 : f32
    %366 = vector.broadcast %cst_83 : f32 to vector<16x128xf32>
    %367 = arith.cmpf oeq, %365, %366 : vector<16x128xf32>
    %cst_84 = arith.constant 1.000000e+00 : f32
    %368 = vector.broadcast %cst_84 : f32 to vector<16x128xf32>
    %369 = arith.maximumf %365, %368 : vector<16x128xf32>
    %370 = arith.divf %349, %369 : vector<16x128xf32>
    %371 = arith.select %367, %232, %370 : vector<16x128xi1>, vector<16x128xf32>
    %cst_85 = arith.constant 0.000000e+00 : f32
    %372 = vector.broadcast %cst_85 : f32 to vector<16x128xf32>
    %373 = arith.cmpf oeq, %300, %372 : vector<16x128xf32>
    %374 = arith.select %373, %371, %232 : vector<16x128xi1>, vector<16x128xf32>
    %c1_i32_86 = arith.constant 1 : i32
    %375 = tpu.dynamic_rotate %58 by %c1_i32_86 dim 0 : vector<16x128xf32>, i32 -> vector<16x128xf32>
    %376 = vector.extract_strided_slice %58 {offsets = [0, 0], sizes = [1, 128], strides = [1, 1]} : vector<16x128xf32> to vector<1x128xf32>
    %c1_i32_87 = arith.constant 1 : i32
    %377 = vector.broadcast %c1_i32_87 : i32 to vector<16x128xi32>
    %378 = arith.cmpi slt, %2, %377 : vector<16x128xi32>
    %379 = vector.shape_cast %376 : vector<1x128xf32> to vector<1x128xf32>
    %380 = vector.broadcast %379 : vector<1x128xf32> to vector<16x128xf32>
    %381 = arith.select %378, %380, %375 : vector<16x128xi1>, vector<16x128xf32>
    %c15_i32_88 = arith.constant 15 : i32
    %382 = tpu.dynamic_rotate %58 by %c15_i32_88 dim 0 : vector<16x128xf32>, i32 -> vector<16x128xf32>
    %383 = vector.extract_strided_slice %58 {offsets = [15, 0], sizes = [1, 128], strides = [1, 1]} : vector<16x128xf32> to vector<1x128xf32>
    %c14_i32_89 = arith.constant 14 : i32
    %384 = vector.broadcast %c14_i32_89 : i32 to vector<16x128xi32>
    %385 = arith.cmpi sgt, %2, %384 : vector<16x128xi32>
    %386 = vector.shape_cast %383 : vector<1x128xf32> to vector<1x128xf32>
    %387 = vector.broadcast %386 : vector<1x128xf32> to vector<16x128xf32>
    %388 = arith.select %385, %387, %382 : vector<16x128xi1>, vector<16x128xf32>
    %389 = arith.maximumf %381, %388 : vector<16x128xf32>
    %390 = arith.maximumf %58, %389 : vector<16x128xf32>
    %c1_i32_90 = arith.constant 1 : i32
    %391 = tpu.dynamic_rotate %390 by %c1_i32_90 dim 1 : vector<16x128xf32>, i32 -> vector<16x128xf32>
    %392 = vector.extract_strided_slice %390 {offsets = [0, 0], sizes = [16, 1], strides = [1, 1]} : vector<16x128xf32> to vector<16x1xf32>
    %c1_i32_91 = arith.constant 1 : i32
    %393 = vector.broadcast %c1_i32_91 : i32 to vector<16x128xi32>
    %394 = arith.cmpi slt, %3, %393 : vector<16x128xi32>
    %395 = vector.shape_cast %392 : vector<16x1xf32> to vector<16x1xf32>
    %396 = vector.broadcast %395 : vector<16x1xf32> to vector<16x128xf32>
    %397 = arith.select %394, %396, %391 : vector<16x128xi1>, vector<16x128xf32>
    %c127_i32_92 = arith.constant 127 : i32
    %398 = tpu.dynamic_rotate %390 by %c127_i32_92 dim 1 : vector<16x128xf32>, i32 -> vector<16x128xf32>
    %399 = vector.extract_strided_slice %390 {offsets = [0, 15], sizes = [16, 1], strides = [1, 1]} : vector<16x128xf32> to vector<16x1xf32>
    %c14_i32_93 = arith.constant 14 : i32
    %400 = vector.broadcast %c14_i32_93 : i32 to vector<16x128xi32>
    %401 = arith.cmpi sgt, %3, %400 : vector<16x128xi32>
    %402 = vector.shape_cast %399 : vector<16x1xf32> to vector<16x1xf32>
    %403 = vector.broadcast %402 : vector<16x1xf32> to vector<16x128xf32>
    %404 = arith.select %401, %403, %398 : vector<16x128xi1>, vector<16x128xf32>
    %405 = arith.maximumf %397, %404 : vector<16x128xf32>
    %406 = arith.maximumf %390, %405 : vector<16x128xf32>
    %cst_94 = arith.constant 0.000000e+00 : f32
    %407 = vector.broadcast %cst_94 : f32 to vector<16x128xf32>
    %408 = arith.cmpf oeq, %406, %407 : vector<16x128xf32>
    %409 = arith.extui %408 : vector<16x128xi1> to vector<16x128xi32>
    %410 = arith.sitofp %409 : vector<16x128xi32> to vector<16x128xf32>
    %411 = arith.mulf %374, %410 : vector<16x128xf32>
    %c1_i32_95 = arith.constant 1 : i32
    %412 = tpu.dynamic_rotate %411 by %c1_i32_95 dim 0 : vector<16x128xf32>, i32 -> vector<16x128xf32>
    %413 = vector.extract_strided_slice %411 {offsets = [0, 0], sizes = [1, 128], strides = [1, 1]} : vector<16x128xf32> to vector<1x128xf32>
    %c1_i32_96 = arith.constant 1 : i32
    %414 = vector.broadcast %c1_i32_96 : i32 to vector<16x128xi32>
    %415 = arith.cmpi slt, %2, %414 : vector<16x128xi32>
    %416 = vector.shape_cast %413 : vector<1x128xf32> to vector<1x128xf32>
    %417 = vector.broadcast %416 : vector<1x128xf32> to vector<16x128xf32>
    %418 = arith.select %415, %417, %412 : vector<16x128xi1>, vector<16x128xf32>
    %419 = arith.addf %411, %418 : vector<16x128xf32>
    %c15_i32_97 = arith.constant 15 : i32
    %420 = tpu.dynamic_rotate %411 by %c15_i32_97 dim 0 : vector<16x128xf32>, i32 -> vector<16x128xf32>
    %421 = vector.extract_strided_slice %411 {offsets = [15, 0], sizes = [1, 128], strides = [1, 1]} : vector<16x128xf32> to vector<1x128xf32>
    %c14_i32_98 = arith.constant 14 : i32
    %422 = vector.broadcast %c14_i32_98 : i32 to vector<16x128xi32>
    %423 = arith.cmpi sgt, %2, %422 : vector<16x128xi32>
    %424 = vector.shape_cast %421 : vector<1x128xf32> to vector<1x128xf32>
    %425 = vector.broadcast %424 : vector<1x128xf32> to vector<16x128xf32>
    %426 = arith.select %423, %425, %420 : vector<16x128xi1>, vector<16x128xf32>
    %427 = arith.addf %419, %426 : vector<16x128xf32>
    %c1_i32_99 = arith.constant 1 : i32
    %428 = tpu.dynamic_rotate %410 by %c1_i32_99 dim 0 : vector<16x128xf32>, i32 -> vector<16x128xf32>
    %429 = vector.extract_strided_slice %410 {offsets = [0, 0], sizes = [1, 128], strides = [1, 1]} : vector<16x128xf32> to vector<1x128xf32>
    %c1_i32_100 = arith.constant 1 : i32
    %430 = vector.broadcast %c1_i32_100 : i32 to vector<16x128xi32>
    %431 = arith.cmpi slt, %2, %430 : vector<16x128xi32>
    %432 = vector.shape_cast %429 : vector<1x128xf32> to vector<1x128xf32>
    %433 = vector.broadcast %432 : vector<1x128xf32> to vector<16x128xf32>
    %434 = arith.select %431, %433, %428 : vector<16x128xi1>, vector<16x128xf32>
    %435 = arith.addf %410, %434 : vector<16x128xf32>
    %c15_i32_101 = arith.constant 15 : i32
    %436 = tpu.dynamic_rotate %410 by %c15_i32_101 dim 0 : vector<16x128xf32>, i32 -> vector<16x128xf32>
    %437 = vector.extract_strided_slice %410 {offsets = [15, 0], sizes = [1, 128], strides = [1, 1]} : vector<16x128xf32> to vector<1x128xf32>
    %c14_i32_102 = arith.constant 14 : i32
    %438 = vector.broadcast %c14_i32_102 : i32 to vector<16x128xi32>
    %439 = arith.cmpi sgt, %2, %438 : vector<16x128xi32>
    %440 = vector.shape_cast %437 : vector<1x128xf32> to vector<1x128xf32>
    %441 = vector.broadcast %440 : vector<1x128xf32> to vector<16x128xf32>
    %442 = arith.select %439, %441, %436 : vector<16x128xi1>, vector<16x128xf32>
    %443 = arith.addf %435, %442 : vector<16x128xf32>
    %c1_i32_103 = arith.constant 1 : i32
    %444 = tpu.dynamic_rotate %427 by %c1_i32_103 dim 1 : vector<16x128xf32>, i32 -> vector<16x128xf32>
    %445 = vector.extract_strided_slice %427 {offsets = [0, 0], sizes = [16, 1], strides = [1, 1]} : vector<16x128xf32> to vector<16x1xf32>
    %c1_i32_104 = arith.constant 1 : i32
    %446 = vector.broadcast %c1_i32_104 : i32 to vector<16x128xi32>
    %447 = arith.cmpi slt, %3, %446 : vector<16x128xi32>
    %448 = vector.shape_cast %445 : vector<16x1xf32> to vector<16x1xf32>
    %449 = vector.broadcast %448 : vector<16x1xf32> to vector<16x128xf32>
    %450 = arith.select %447, %449, %444 : vector<16x128xi1>, vector<16x128xf32>
    %451 = arith.addf %427, %450 : vector<16x128xf32>
    %c127_i32_105 = arith.constant 127 : i32
    %452 = tpu.dynamic_rotate %427 by %c127_i32_105 dim 1 : vector<16x128xf32>, i32 -> vector<16x128xf32>
    %453 = vector.extract_strided_slice %427 {offsets = [0, 15], sizes = [16, 1], strides = [1, 1]} : vector<16x128xf32> to vector<16x1xf32>
    %c14_i32_106 = arith.constant 14 : i32
    %454 = vector.broadcast %c14_i32_106 : i32 to vector<16x128xi32>
    %455 = arith.cmpi sgt, %3, %454 : vector<16x128xi32>
    %456 = vector.shape_cast %453 : vector<16x1xf32> to vector<16x1xf32>
    %457 = vector.broadcast %456 : vector<16x1xf32> to vector<16x128xf32>
    %458 = arith.select %455, %457, %452 : vector<16x128xi1>, vector<16x128xf32>
    %459 = arith.addf %451, %458 : vector<16x128xf32>
    %c1_i32_107 = arith.constant 1 : i32
    %460 = tpu.dynamic_rotate %443 by %c1_i32_107 dim 1 : vector<16x128xf32>, i32 -> vector<16x128xf32>
    %461 = vector.extract_strided_slice %443 {offsets = [0, 0], sizes = [16, 1], strides = [1, 1]} : vector<16x128xf32> to vector<16x1xf32>
    %c1_i32_108 = arith.constant 1 : i32
    %462 = vector.broadcast %c1_i32_108 : i32 to vector<16x128xi32>
    %463 = arith.cmpi slt, %3, %462 : vector<16x128xi32>
    %464 = vector.shape_cast %461 : vector<16x1xf32> to vector<16x1xf32>
    %465 = vector.broadcast %464 : vector<16x1xf32> to vector<16x128xf32>
    %466 = arith.select %463, %465, %460 : vector<16x128xi1>, vector<16x128xf32>
    %467 = arith.addf %443, %466 : vector<16x128xf32>
    %c127_i32_109 = arith.constant 127 : i32
    %468 = tpu.dynamic_rotate %443 by %c127_i32_109 dim 1 : vector<16x128xf32>, i32 -> vector<16x128xf32>
    %469 = vector.extract_strided_slice %443 {offsets = [0, 15], sizes = [16, 1], strides = [1, 1]} : vector<16x128xf32> to vector<16x1xf32>
    %c14_i32_110 = arith.constant 14 : i32
    %470 = vector.broadcast %c14_i32_110 : i32 to vector<16x128xi32>
    %471 = arith.cmpi sgt, %3, %470 : vector<16x128xi32>
    %472 = vector.shape_cast %469 : vector<16x1xf32> to vector<16x1xf32>
    %473 = vector.broadcast %472 : vector<16x1xf32> to vector<16x128xf32>
    %474 = arith.select %471, %473, %468 : vector<16x128xi1>, vector<16x128xf32>
    %475 = arith.addf %467, %474 : vector<16x128xf32>
    %cst_111 = arith.constant 0.000000e+00 : f32
    %476 = vector.broadcast %cst_111 : f32 to vector<16x128xf32>
    %477 = arith.cmpf oeq, %475, %476 : vector<16x128xf32>
    %cst_112 = arith.constant 1.000000e+00 : f32
    %478 = vector.broadcast %cst_112 : f32 to vector<16x128xf32>
    %479 = arith.maximumf %475, %478 : vector<16x128xf32>
    %480 = arith.divf %459, %479 : vector<16x128xf32>
    %481 = arith.select %477, %374, %480 : vector<16x128xi1>, vector<16x128xf32>
    %cst_113 = arith.constant 0.000000e+00 : f32
    %482 = vector.broadcast %cst_113 : f32 to vector<16x128xf32>
    %483 = arith.cmpf oeq, %410, %482 : vector<16x128xf32>
    %484 = arith.select %483, %481, %374 : vector<16x128xi1>, vector<16x128xf32>
    %cst_114 = arith.constant 0.000000e+00 : f32
    %485 = vector.broadcast %cst_114 : f32 to vector<16x128xf32>
    %486 = arith.cmpf oeq, %58, %485 : vector<16x128xf32>
    %487 = arith.extui %486 : vector<16x128xi1> to vector<16x128xi32>
    %488 = arith.sitofp %487 : vector<16x128xi32> to vector<16x128xf32>
    %489 = arith.mulf %484, %488 : vector<16x128xf32>
    %c1_i32_115 = arith.constant 1 : i32
    %490 = tpu.dynamic_rotate %489 by %c1_i32_115 dim 0 : vector<16x128xf32>, i32 -> vector<16x128xf32>
    %491 = vector.extract_strided_slice %489 {offsets = [0, 0], sizes = [1, 128], strides = [1, 1]} : vector<16x128xf32> to vector<1x128xf32>
    %c1_i32_116 = arith.constant 1 : i32
    %492 = vector.broadcast %c1_i32_116 : i32 to vector<16x128xi32>
    %493 = arith.cmpi slt, %2, %492 : vector<16x128xi32>
    %494 = vector.shape_cast %491 : vector<1x128xf32> to vector<1x128xf32>
    %495 = vector.broadcast %494 : vector<1x128xf32> to vector<16x128xf32>
    %496 = arith.select %493, %495, %490 : vector<16x128xi1>, vector<16x128xf32>
    %497 = arith.addf %489, %496 : vector<16x128xf32>
    %c15_i32_117 = arith.constant 15 : i32
    %498 = tpu.dynamic_rotate %489 by %c15_i32_117 dim 0 : vector<16x128xf32>, i32 -> vector<16x128xf32>
    %499 = vector.extract_strided_slice %489 {offsets = [15, 0], sizes = [1, 128], strides = [1, 1]} : vector<16x128xf32> to vector<1x128xf32>
    %c14_i32_118 = arith.constant 14 : i32
    %500 = vector.broadcast %c14_i32_118 : i32 to vector<16x128xi32>
    %501 = arith.cmpi sgt, %2, %500 : vector<16x128xi32>
    %502 = vector.shape_cast %499 : vector<1x128xf32> to vector<1x128xf32>
    %503 = vector.broadcast %502 : vector<1x128xf32> to vector<16x128xf32>
    %504 = arith.select %501, %503, %498 : vector<16x128xi1>, vector<16x128xf32>
    %505 = arith.addf %497, %504 : vector<16x128xf32>
    %c1_i32_119 = arith.constant 1 : i32
    %506 = tpu.dynamic_rotate %488 by %c1_i32_119 dim 0 : vector<16x128xf32>, i32 -> vector<16x128xf32>
    %507 = vector.extract_strided_slice %488 {offsets = [0, 0], sizes = [1, 128], strides = [1, 1]} : vector<16x128xf32> to vector<1x128xf32>
    %c1_i32_120 = arith.constant 1 : i32
    %508 = vector.broadcast %c1_i32_120 : i32 to vector<16x128xi32>
    %509 = arith.cmpi slt, %2, %508 : vector<16x128xi32>
    %510 = vector.shape_cast %507 : vector<1x128xf32> to vector<1x128xf32>
    %511 = vector.broadcast %510 : vector<1x128xf32> to vector<16x128xf32>
    %512 = arith.select %509, %511, %506 : vector<16x128xi1>, vector<16x128xf32>
    %513 = arith.addf %488, %512 : vector<16x128xf32>
    %c15_i32_121 = arith.constant 15 : i32
    %514 = tpu.dynamic_rotate %488 by %c15_i32_121 dim 0 : vector<16x128xf32>, i32 -> vector<16x128xf32>
    %515 = vector.extract_strided_slice %488 {offsets = [15, 0], sizes = [1, 128], strides = [1, 1]} : vector<16x128xf32> to vector<1x128xf32>
    %c14_i32_122 = arith.constant 14 : i32
    %516 = vector.broadcast %c14_i32_122 : i32 to vector<16x128xi32>
    %517 = arith.cmpi sgt, %2, %516 : vector<16x128xi32>
    %518 = vector.shape_cast %515 : vector<1x128xf32> to vector<1x128xf32>
    %519 = vector.broadcast %518 : vector<1x128xf32> to vector<16x128xf32>
    %520 = arith.select %517, %519, %514 : vector<16x128xi1>, vector<16x128xf32>
    %521 = arith.addf %513, %520 : vector<16x128xf32>
    %c1_i32_123 = arith.constant 1 : i32
    %522 = tpu.dynamic_rotate %505 by %c1_i32_123 dim 1 : vector<16x128xf32>, i32 -> vector<16x128xf32>
    %523 = vector.extract_strided_slice %505 {offsets = [0, 0], sizes = [16, 1], strides = [1, 1]} : vector<16x128xf32> to vector<16x1xf32>
    %c1_i32_124 = arith.constant 1 : i32
    %524 = vector.broadcast %c1_i32_124 : i32 to vector<16x128xi32>
    %525 = arith.cmpi slt, %3, %524 : vector<16x128xi32>
    %526 = vector.shape_cast %523 : vector<16x1xf32> to vector<16x1xf32>
    %527 = vector.broadcast %526 : vector<16x1xf32> to vector<16x128xf32>
    %528 = arith.select %525, %527, %522 : vector<16x128xi1>, vector<16x128xf32>
    %529 = arith.addf %505, %528 : vector<16x128xf32>
    %c127_i32_125 = arith.constant 127 : i32
    %530 = tpu.dynamic_rotate %505 by %c127_i32_125 dim 1 : vector<16x128xf32>, i32 -> vector<16x128xf32>
    %531 = vector.extract_strided_slice %505 {offsets = [0, 15], sizes = [16, 1], strides = [1, 1]} : vector<16x128xf32> to vector<16x1xf32>
    %c14_i32_126 = arith.constant 14 : i32
    %532 = vector.broadcast %c14_i32_126 : i32 to vector<16x128xi32>
    %533 = arith.cmpi sgt, %3, %532 : vector<16x128xi32>
    %534 = vector.shape_cast %531 : vector<16x1xf32> to vector<16x1xf32>
    %535 = vector.broadcast %534 : vector<16x1xf32> to vector<16x128xf32>
    %536 = arith.select %533, %535, %530 : vector<16x128xi1>, vector<16x128xf32>
    %537 = arith.addf %529, %536 : vector<16x128xf32>
    %c1_i32_127 = arith.constant 1 : i32
    %538 = tpu.dynamic_rotate %521 by %c1_i32_127 dim 1 : vector<16x128xf32>, i32 -> vector<16x128xf32>
    %539 = vector.extract_strided_slice %521 {offsets = [0, 0], sizes = [16, 1], strides = [1, 1]} : vector<16x128xf32> to vector<16x1xf32>
    %c1_i32_128 = arith.constant 1 : i32
    %540 = vector.broadcast %c1_i32_128 : i32 to vector<16x128xi32>
    %541 = arith.cmpi slt, %3, %540 : vector<16x128xi32>
    %542 = vector.shape_cast %539 : vector<16x1xf32> to vector<16x1xf32>
    %543 = vector.broadcast %542 : vector<16x1xf32> to vector<16x128xf32>
    %544 = arith.select %541, %543, %538 : vector<16x128xi1>, vector<16x128xf32>
    %545 = arith.addf %521, %544 : vector<16x128xf32>
    %c127_i32_129 = arith.constant 127 : i32
    %546 = tpu.dynamic_rotate %521 by %c127_i32_129 dim 1 : vector<16x128xf32>, i32 -> vector<16x128xf32>
    %547 = vector.extract_strided_slice %521 {offsets = [0, 15], sizes = [16, 1], strides = [1, 1]} : vector<16x128xf32> to vector<16x1xf32>
    %c14_i32_130 = arith.constant 14 : i32
    %548 = vector.broadcast %c14_i32_130 : i32 to vector<16x128xi32>
    %549 = arith.cmpi sgt, %3, %548 : vector<16x128xi32>
    %550 = vector.shape_cast %547 : vector<16x1xf32> to vector<16x1xf32>
    %551 = vector.broadcast %550 : vector<16x1xf32> to vector<16x128xf32>
    %552 = arith.select %549, %551, %546 : vector<16x128xi1>, vector<16x128xf32>
    %553 = arith.addf %545, %552 : vector<16x128xf32>
    %cst_131 = arith.constant 0.000000e+00 : f32
    %554 = vector.broadcast %cst_131 : f32 to vector<16x128xf32>
    %555 = arith.cmpf oeq, %553, %554 : vector<16x128xf32>
    %cst_132 = arith.constant 1.000000e+00 : f32
    %556 = vector.broadcast %cst_132 : f32 to vector<16x128xf32>
    %557 = arith.maximumf %553, %556 : vector<16x128xf32>
    %558 = arith.divf %537, %557 : vector<16x128xf32>
    %559 = arith.select %555, %484, %558 : vector<16x128xi1>, vector<16x128xf32>
    %cst_133 = arith.constant 0.000000e+00 : f32
    %560 = vector.broadcast %cst_133 : f32 to vector<16x128xf32>
    %561 = arith.cmpf oeq, %488, %560 : vector<16x128xf32>
    %562 = arith.select %561, %559, %484 : vector<16x128xi1>, vector<16x128xf32>
    %cst_134 = arith.constant 0.000000e+00 : f32
    %563 = vector.broadcast %cst_134 : f32 to vector<16x128xf32>
    %c2_i32_135 = arith.constant 2 : i32
    %564 = tpu.dynamic_rotate %562 by %c2_i32_135 dim 0 : vector<16x128xf32>, i32 -> vector<16x128xf32>
    %565 = vector.extract_strided_slice %562 {offsets = [0, 0], sizes = [1, 128], strides = [1, 1]} : vector<16x128xf32> to vector<1x128xf32>
    %c18_i32 = arith.constant 18 : i32
    %566 = vector.broadcast %c18_i32 : i32 to vector<16x128xi32>
    %567 = arith.cmpi slt, %2, %566 : vector<16x128xi32>
    %568 = vector.shape_cast %565 : vector<1x128xf32> to vector<1x128xf32>
    %569 = vector.broadcast %568 : vector<1x128xf32> to vector<16x128xf32>
    %570 = arith.select %567, %569, %564 : vector<16x128xi1>, vector<16x128xf32>
    %cst_136 = arith.constant 0.00443304796 : f32
    %571 = vector.broadcast %cst_136 : f32 to vector<16x128xf32>
    %572 = arith.mulf %571, %570 : vector<16x128xf32>
    %573 = arith.addf %563, %572 : vector<16x128xf32>
    %c12_i32_137 = arith.constant 12 : i32
    %574 = tpu.dynamic_rotate %562 by %c12_i32_137 dim 0 : vector<16x128xf32>, i32 -> vector<16x128xf32>
    %575 = vector.extract_strided_slice %562 {offsets = [0, 0], sizes = [1, 128], strides = [1, 1]} : vector<16x128xf32> to vector<1x128xf32>
    %c12_i32_138 = arith.constant 12 : i32
    %576 = vector.broadcast %c12_i32_138 : i32 to vector<16x128xi32>
    %577 = arith.cmpi slt, %2, %576 : vector<16x128xi32>
    %578 = vector.shape_cast %575 : vector<1x128xf32> to vector<1x128xf32>
    %579 = vector.broadcast %578 : vector<1x128xf32> to vector<16x128xf32>
    %580 = arith.select %577, %579, %574 : vector<16x128xi1>, vector<16x128xf32>
    %cst_139 = arith.constant 0.0540055819 : f32
    %581 = vector.broadcast %cst_139 : f32 to vector<16x128xf32>
    %582 = arith.mulf %581, %580 : vector<16x128xf32>
    %583 = arith.addf %573, %582 : vector<16x128xf32>
    %c6_i32 = arith.constant 6 : i32
    %584 = tpu.dynamic_rotate %562 by %c6_i32 dim 0 : vector<16x128xf32>, i32 -> vector<16x128xf32>
    %585 = vector.extract_strided_slice %562 {offsets = [0, 0], sizes = [1, 128], strides = [1, 1]} : vector<16x128xf32> to vector<1x128xf32>
    %c6_i32_140 = arith.constant 6 : i32
    %586 = vector.broadcast %c6_i32_140 : i32 to vector<16x128xi32>
    %587 = arith.cmpi slt, %2, %586 : vector<16x128xi32>
    %588 = vector.shape_cast %585 : vector<1x128xf32> to vector<1x128xf32>
    %589 = vector.broadcast %588 : vector<1x128xf32> to vector<16x128xf32>
    %590 = arith.select %587, %589, %584 : vector<16x128xi1>, vector<16x128xf32>
    %cst_141 = arith.constant 0.242036223 : f32
    %591 = vector.broadcast %cst_141 : f32 to vector<16x128xf32>
    %592 = arith.mulf %591, %590 : vector<16x128xf32>
    %593 = arith.addf %583, %592 : vector<16x128xf32>
    %cst_142 = arith.constant 0.399050266 : f32
    %594 = vector.broadcast %cst_142 : f32 to vector<16x128xf32>
    %595 = arith.mulf %594, %562 : vector<16x128xf32>
    %596 = arith.addf %593, %595 : vector<16x128xf32>
    %c10_i32 = arith.constant 10 : i32
    %597 = tpu.dynamic_rotate %562 by %c10_i32 dim 0 : vector<16x128xf32>, i32 -> vector<16x128xf32>
    %598 = vector.extract_strided_slice %562 {offsets = [15, 0], sizes = [1, 128], strides = [1, 1]} : vector<16x128xf32> to vector<1x128xf32>
    %c9_i32 = arith.constant 9 : i32
    %599 = vector.broadcast %c9_i32 : i32 to vector<16x128xi32>
    %600 = arith.cmpi sgt, %2, %599 : vector<16x128xi32>
    %601 = vector.shape_cast %598 : vector<1x128xf32> to vector<1x128xf32>
    %602 = vector.broadcast %601 : vector<1x128xf32> to vector<16x128xf32>
    %603 = arith.select %600, %602, %597 : vector<16x128xi1>, vector<16x128xf32>
    %cst_143 = arith.constant 0.242036223 : f32
    %604 = vector.broadcast %cst_143 : f32 to vector<16x128xf32>
    %605 = arith.mulf %604, %603 : vector<16x128xf32>
    %606 = arith.addf %596, %605 : vector<16x128xf32>
    %c4_i32 = arith.constant 4 : i32
    %607 = tpu.dynamic_rotate %562 by %c4_i32 dim 0 : vector<16x128xf32>, i32 -> vector<16x128xf32>
    %608 = vector.extract_strided_slice %562 {offsets = [15, 0], sizes = [1, 128], strides = [1, 1]} : vector<16x128xf32> to vector<1x128xf32>
    %c3_i32_144 = arith.constant 3 : i32
    %609 = vector.broadcast %c3_i32_144 : i32 to vector<16x128xi32>
    %610 = arith.cmpi sgt, %2, %609 : vector<16x128xi32>
    %611 = vector.shape_cast %608 : vector<1x128xf32> to vector<1x128xf32>
    %612 = vector.broadcast %611 : vector<1x128xf32> to vector<16x128xf32>
    %613 = arith.select %610, %612, %607 : vector<16x128xi1>, vector<16x128xf32>
    %cst_145 = arith.constant 0.0540055819 : f32
    %614 = vector.broadcast %cst_145 : f32 to vector<16x128xf32>
    %615 = arith.mulf %614, %613 : vector<16x128xf32>
    %616 = arith.addf %606, %615 : vector<16x128xf32>
    %c14_i32_146 = arith.constant 14 : i32
    %617 = tpu.dynamic_rotate %562 by %c14_i32_146 dim 0 : vector<16x128xf32>, i32 -> vector<16x128xf32>
    %618 = vector.extract_strided_slice %562 {offsets = [15, 0], sizes = [1, 128], strides = [1, 1]} : vector<16x128xf32> to vector<1x128xf32>
    %c-3_i32 = arith.constant -3 : i32
    %619 = vector.broadcast %c-3_i32 : i32 to vector<16x128xi32>
    %620 = arith.cmpi sgt, %2, %619 : vector<16x128xi32>
    %621 = vector.shape_cast %618 : vector<1x128xf32> to vector<1x128xf32>
    %622 = vector.broadcast %621 : vector<1x128xf32> to vector<16x128xf32>
    %623 = arith.select %620, %622, %617 : vector<16x128xi1>, vector<16x128xf32>
    %cst_147 = arith.constant 0.00443304796 : f32
    %624 = vector.broadcast %cst_147 : f32 to vector<16x128xf32>
    %625 = arith.mulf %624, %623 : vector<16x128xf32>
    %626 = arith.addf %616, %625 : vector<16x128xf32>
    %cst_148 = arith.constant 0.000000e+00 : f32
    %627 = vector.broadcast %cst_148 : f32 to vector<16x128xf32>
    %c18_i32_149 = arith.constant 18 : i32
    %628 = tpu.dynamic_rotate %626 by %c18_i32_149 dim 1 : vector<16x128xf32>, i32 -> vector<16x128xf32>
    %629 = vector.extract_strided_slice %626 {offsets = [0, 0], sizes = [16, 1], strides = [1, 1]} : vector<16x128xf32> to vector<16x1xf32>
    %c18_i32_150 = arith.constant 18 : i32
    %630 = vector.broadcast %c18_i32_150 : i32 to vector<16x128xi32>
    %631 = arith.cmpi slt, %3, %630 : vector<16x128xi32>
    %632 = vector.shape_cast %629 : vector<16x1xf32> to vector<16x1xf32>
    %633 = vector.broadcast %632 : vector<16x1xf32> to vector<16x128xf32>
    %634 = arith.select %631, %633, %628 : vector<16x128xi1>, vector<16x128xf32>
    %cst_151 = arith.constant 0.00443304796 : f32
    %635 = vector.broadcast %cst_151 : f32 to vector<16x128xf32>
    %636 = arith.mulf %635, %634 : vector<16x128xf32>
    %637 = arith.addf %627, %636 : vector<16x128xf32>
    %c12_i32_152 = arith.constant 12 : i32
    %638 = tpu.dynamic_rotate %626 by %c12_i32_152 dim 1 : vector<16x128xf32>, i32 -> vector<16x128xf32>
    %639 = vector.extract_strided_slice %626 {offsets = [0, 0], sizes = [16, 1], strides = [1, 1]} : vector<16x128xf32> to vector<16x1xf32>
    %c12_i32_153 = arith.constant 12 : i32
    %640 = vector.broadcast %c12_i32_153 : i32 to vector<16x128xi32>
    %641 = arith.cmpi slt, %3, %640 : vector<16x128xi32>
    %642 = vector.shape_cast %639 : vector<16x1xf32> to vector<16x1xf32>
    %643 = vector.broadcast %642 : vector<16x1xf32> to vector<16x128xf32>
    %644 = arith.select %641, %643, %638 : vector<16x128xi1>, vector<16x128xf32>
    %cst_154 = arith.constant 0.0540055819 : f32
    %645 = vector.broadcast %cst_154 : f32 to vector<16x128xf32>
    %646 = arith.mulf %645, %644 : vector<16x128xf32>
    %647 = arith.addf %637, %646 : vector<16x128xf32>
    %c6_i32_155 = arith.constant 6 : i32
    %648 = tpu.dynamic_rotate %626 by %c6_i32_155 dim 1 : vector<16x128xf32>, i32 -> vector<16x128xf32>
    %649 = vector.extract_strided_slice %626 {offsets = [0, 0], sizes = [16, 1], strides = [1, 1]} : vector<16x128xf32> to vector<16x1xf32>
    %c6_i32_156 = arith.constant 6 : i32
    %650 = vector.broadcast %c6_i32_156 : i32 to vector<16x128xi32>
    %651 = arith.cmpi slt, %3, %650 : vector<16x128xi32>
    %652 = vector.shape_cast %649 : vector<16x1xf32> to vector<16x1xf32>
    %653 = vector.broadcast %652 : vector<16x1xf32> to vector<16x128xf32>
    %654 = arith.select %651, %653, %648 : vector<16x128xi1>, vector<16x128xf32>
    %cst_157 = arith.constant 0.242036223 : f32
    %655 = vector.broadcast %cst_157 : f32 to vector<16x128xf32>
    %656 = arith.mulf %655, %654 : vector<16x128xf32>
    %657 = arith.addf %647, %656 : vector<16x128xf32>
    %cst_158 = arith.constant 0.399050266 : f32
    %658 = vector.broadcast %cst_158 : f32 to vector<16x128xf32>
    %659 = arith.mulf %658, %626 : vector<16x128xf32>
    %660 = arith.addf %657, %659 : vector<16x128xf32>
    %c122_i32 = arith.constant 122 : i32
    %661 = tpu.dynamic_rotate %626 by %c122_i32 dim 1 : vector<16x128xf32>, i32 -> vector<16x128xf32>
    %662 = vector.extract_strided_slice %626 {offsets = [0, 15], sizes = [16, 1], strides = [1, 1]} : vector<16x128xf32> to vector<16x1xf32>
    %c9_i32_159 = arith.constant 9 : i32
    %663 = vector.broadcast %c9_i32_159 : i32 to vector<16x128xi32>
    %664 = arith.cmpi sgt, %3, %663 : vector<16x128xi32>
    %665 = vector.shape_cast %662 : vector<16x1xf32> to vector<16x1xf32>
    %666 = vector.broadcast %665 : vector<16x1xf32> to vector<16x128xf32>
    %667 = arith.select %664, %666, %661 : vector<16x128xi1>, vector<16x128xf32>
    %cst_160 = arith.constant 0.242036223 : f32
    %668 = vector.broadcast %cst_160 : f32 to vector<16x128xf32>
    %669 = arith.mulf %668, %667 : vector<16x128xf32>
    %670 = arith.addf %660, %669 : vector<16x128xf32>
    %c116_i32 = arith.constant 116 : i32
    %671 = tpu.dynamic_rotate %626 by %c116_i32 dim 1 : vector<16x128xf32>, i32 -> vector<16x128xf32>
    %672 = vector.extract_strided_slice %626 {offsets = [0, 15], sizes = [16, 1], strides = [1, 1]} : vector<16x128xf32> to vector<16x1xf32>
    %c3_i32_161 = arith.constant 3 : i32
    %673 = vector.broadcast %c3_i32_161 : i32 to vector<16x128xi32>
    %674 = arith.cmpi sgt, %3, %673 : vector<16x128xi32>
    %675 = vector.shape_cast %672 : vector<16x1xf32> to vector<16x1xf32>
    %676 = vector.broadcast %675 : vector<16x1xf32> to vector<16x128xf32>
    %677 = arith.select %674, %676, %671 : vector<16x128xi1>, vector<16x128xf32>
    %cst_162 = arith.constant 0.0540055819 : f32
    %678 = vector.broadcast %cst_162 : f32 to vector<16x128xf32>
    %679 = arith.mulf %678, %677 : vector<16x128xf32>
    %680 = arith.addf %670, %679 : vector<16x128xf32>
    %c110_i32 = arith.constant 110 : i32
    %681 = tpu.dynamic_rotate %626 by %c110_i32 dim 1 : vector<16x128xf32>, i32 -> vector<16x128xf32>
    %682 = vector.extract_strided_slice %626 {offsets = [0, 15], sizes = [16, 1], strides = [1, 1]} : vector<16x128xf32> to vector<16x1xf32>
    %c-3_i32_163 = arith.constant -3 : i32
    %683 = vector.broadcast %c-3_i32_163 : i32 to vector<16x128xi32>
    %684 = arith.cmpi sgt, %3, %683 : vector<16x128xi32>
    %685 = vector.shape_cast %682 : vector<16x1xf32> to vector<16x1xf32>
    %686 = vector.broadcast %685 : vector<16x1xf32> to vector<16x128xf32>
    %687 = arith.select %684, %686, %681 : vector<16x128xi1>, vector<16x128xf32>
    %cst_164 = arith.constant 0.00443304796 : f32
    %688 = vector.broadcast %cst_164 : f32 to vector<16x128xf32>
    %689 = arith.mulf %688, %687 : vector<16x128xf32>
    %690 = arith.addf %680, %689 : vector<16x128xf32>
    %c0_165 = arith.constant 0 : index
    %c0_166 = arith.constant 0 : index
    %c0_167 = arith.constant 0 : index
    %691 = vector.load %arg3[%c0_165, %c0_166, %c0_167] : memref<1x16x128xf32, #tpu.memory_space<vmem>>, vector<1x16x128xf32>
    %692 = vector.shape_cast %691 : vector<1x16x128xf32> to vector<16x128xf32>
    %693 = vector.shape_cast %690 : vector<16x128xf32> to vector<1x16x128xf32>
    tpu.vector_store %arg3[%c0_165, %c0_166, %c0_167], %693 {strides = array<i32>} : memref<1x16x128xf32, #tpu.memory_space<vmem>>, vector<1x16x128xf32>,
    return
  }
  func.func @transform_0(%arg0: i32) -> (i32, i32, i32) {
    %c0_i32 = arith.constant 0 : i32
    %c0_i32_0 = arith.constant 0 : i32
    %c0_i32_1 = arith.constant 0 : i32
    return %arg0, %c0_i32, %c0_i32_0 : i32, i32, i32
  }
  func.func @transform_1(%arg0: i32) -> (i32, i32, i32) {
    %c0_i32 = arith.constant 0 : i32
    %c0_i32_0 = arith.constant 0 : i32
    %c0_i32_1 = arith.constant 0 : i32
    return %arg0, %c0_i32, %c0_i32_0 : i32, i32, i32
  }
  func.func @transform_2(%arg0: i32) -> (i32, i32, i32) {
    %c0_i32 = arith.constant 0 : i32
    %c0_i32_0 = arith.constant 0 : i32
    %c0_i32_1 = arith.constant 0 : i32
    return %arg0, %c0_i32, %c0_i32_0 : i32, i32, i32
  }
}

</mosaic_0001>

<bundles_post_ra>
// kernel: tpu_custom_call.1
= control target key start
LH: loop header
LB: loop body
LE: loop exit
PB: predicated region body
PF: predicated region fallthrough
CT: control target
= control target key end

     0   :  { %7 = vsyncpa [#allocation3], 0  ;;  %s2745_s0 = inlined_call_operand.hbm [shape: f32[2,16,128], index: 0, kind: input, shape index: {}]   ;;  %s2746_s1 = inlined_call_operand.hbm [shape: s32[2,16,128], index: 1, kind: input, shape index: {}]   ;;  %s2747_s2 = inlined_call_operand.hbm [shape: f32[2,16,128], index: 2, kind: output, shape index: {}]  }
   0x1   :  { %9 = vsyncpa [#allocation3 + $0x1], 0 }
   0x2   :  { %10 = vsyncpa [#allocation6], 0 }
   0x3   :  { %12 = vsyncpa [#allocation6 + $0x1], 0 }
   0x4   :  { %13 = vsyncpa [#allocation4], 0 }
   0x5   :  { %15 = vsyncpa [#allocation4 + $0x1], 0  ;;  %s1771_s9 = smov 0   ;;  %s1773_s10 = smov 0  }
   0x6   :  { %s1775_s11 = smov 0   ;;  %s1777_s12 = smov 0  }
   0x7 LB: > { %s1792_s13 = sadd.s32 4294967295, %s1733_s12   ;;  %s1368_s14 = sadd.s32 4294967294, %s1733_s12   ;;  %s1733_s12 = sphi %s1777_s12, %s2763_s12   ;;  %s1729_s11 = sphi %s1775_s11, %s2762_s11   ;;  %s1725_s10 = sphi %s1773_s10, %s2761_s10   ;;  %s1721_s9 = sphi %s1771_s9, %s2760_s9  }
   0x8   : > { %s1796_s15 = sadd.s32 1, %s1733_s12   ;;  %s28_s16 = sadd.s32 1, %s1729_s11 }
   0x9   : > { %s25_s17 = ssub.s32 %s1733_s12, %s1796_s15  ;;  %p35_p0 = scmp.ne.s32.totalorder %s1729_s11, %s1725_s10 }
   0xa   : > { %p26_p1 = scmp.eq.s32.totalorder %s25_s17, 0  ;;  %p36_p2 = scmp.eq.s32.totalorder %s1733_s12, 0 }
   0xb   : > { %p41_p3 = scmp.ne.s32.totalorder %s1725_s10, %s1721_s9  ;;  %p42_p4 = scmp.eq.s32.totalorder %s1792_s13, 0 }
   0xc   : > { %s1808_s18 = scalar_select %p26_p1, %s1729_s11, %s28_s16  }
   0xd   : > { %p1810_p5 = por %p36_p2, %p35_p0  ;;  %p1814_p6 = por %p42_p4, %p41_p3 }
   0xe   : > { %p91_p7 = scmp.eq.s32.totalorder %s1792_s13, 1  ;;  %p97_p8 = scmp.eq.s32.totalorder %s1368_s14, 1 }
   0xf   : > { %s2751_s20 = scalar_select %p1814_p6, 1, 0 }
  0x10   : > { %p1416_p10 = scmp.lt.s32.totalorder %s1733_s12, 2  ;;  %p1821_p11 = por %p91_p7, %p35_p0 }
  0x11   : > { %p1825_p12 = por %p97_p8, %p41_p3  ;;  %s1830_s23 = sand.u32 1, %s1729_s11  }
  0x12   : > { %s2752_s21 = scalar_select %p1821_p11, 1, 0 }
  0x13   : > { %s2753_s22 = scalar_select %p1825_p12, 1, 0 }
  0x14   : > { %s1396_s24 = sshll.u32 %s1733_s12, 8  ;;  %s1371_s25 = sshll.u32 %s1830_s23, 4 }
  0x15   : > { %s1839_s28 = scalar_lea.hbm %s2745_s0, %s1396_s24  ;;  %s121_s29 = scalar_lea.vmem [#allocation2], %s1371_s25 }
  0x16   : > { %s128_s30 = sshll.u32 %s121_s29, 4  ;;  %p1845_p13 = pnand %p1416_p10, %p1810_p5  ;;  %s1849_s30 = int_to_ptr.vmem [resolvable:$true] %s128_s30 }
  0x17   : > { %s118_s4 = scalar_lea.sflag [#allocation3], %s1830_s23  ;;  %s1609_s5 = scalar_lea.hbm %s1839_s28, 256 }
  0x18   : > { %p1610_p0 = scmp.ne.s32.totalorder %s1839_s28, %s1609_s5  ;;  %p1611_p1 = pneg %p1845_p13 }
  0x19   : > { %s1614_s8 = scalar_lea.hbm %s2745_s0, 512  ;;  %p1615_p4 = scmp.lt.s32.totalorder %s1839_s28, %s2745_s0 }
  0x1a   : > { %p1612_p2 = pnand %p1611_p1, %p1610_p0  ;;  %p1616_p5 = scmp.lt.s32.totalorder %s1614_s8, %s1609_s5 }
  0x1c   : > { %p1613_p3 = pneg %p1612_p2  ;;  %p1617_p7 = por %p1616_p5, %p1615_p4 }
  0x1e   : > { %p1618_p8 = pnand %p1617_p7, %p1613_p3 }
  0x20   : > { %1621 = shalt.err (!%p1618_p8)
}
  0x21   : > { %s1622_s17 = scalar_lea.vmem %s1849_s30, 256  ;;  %s1735_s19 = smov [#allocation2]  }
  0x22   : > { %p1623_p10 = scmp.ne.s32.totalorder %s1849_s30, %s1622_s17  ;;  %s1627_s26 = sshll.u32 %s1735_s19, 4  ;;  %s1628_s26 = int_to_ptr.vmem [resolvable:$false] %s1627_s26 }
  0x23   : > { %s1629_s27 = scalar_lea.vmem %s1628_s26, 512  ;;  %p1630_p9 = scmp.lt.s32.totalorder %s1849_s30, %s1628_s26 }
  0x24   : > { %p1625_p0 = pnand %p1623_p10, %p1611_p1  ;;  %p1631_p12 = scmp.lt.s32.totalorder %s1629_s27, %s1622_s17 }
  0x26   : > { %p1626_p2 = pneg %p1625_p0  ;;  %p1632_p11 = por %p1631_p12, %p1630_p9 }
  0x28   : > { %p1633_p4 = pnand %p1632_p11, %p1626_p2 }
  0x2a   : > { %1636 = shalt.err (!%p1633_p4)
}
  0x2b   : > { %s1736_s29 = smov 128   ;;  %s1737_s5 = smov 8  }
  0x2c   : > { %1408 = dma.hbm_to_vmem [thread:$0]  (!%p1845_p13), %s1839_s28, 256, %s1849_s30, %s118_s4, %s1736_s29, %s1736_s29, %s1737_s5  }
  0x2d   : > { %p1377_p9 = scmp.ge.s32.totalorder %s1733_s12, 1  ;;  %p157_p11 = scmp.lt.s32.totalorder %s1733_s12, 3 }
  0x2e   : > { %s1892_s14 = scalar_lea.hbm %s2746_s1, %s1396_s24  ;;  %s142_s16 = scalar_lea.vmem [#allocation5], %s1371_s25 }
  0x2f   : > { %p1883_p12 = pnand %p1377_p9, %p157_p11  ;;  %s149_s17 = sshll.u32 %s142_s16, 4  ;;  %s1896_s17 = int_to_ptr.vmem [resolvable:$true] %s149_s17 }
  0x30   : > { %s139_s28 = scalar_lea.sflag [#allocation6], %s1830_s23  ;;  %s1637_s30 = scalar_lea.hbm %s1892_s14, 256 }
  0x31   : > { %p1638_p3 = scmp.ne.s32.totalorder %s1892_s14, %s1637_s30  ;;  %s1642_s24 = scalar_lea.hbm %s2746_s1, 512 }
  0x32   : > { %p1643_p8 = scmp.lt.s32.totalorder %s1892_s14, %s2746_s1  ;;  %p1644_p10 = scmp.lt.s32.totalorder %s1642_s24, %s1637_s30 }
  0x33   : > { %p1640_p5 = pnand %p1638_p3, %p1611_p1 }
  0x34   : > { %p1645_p0 = por %p1644_p10, %p1643_p8 }
  0x35   : > { %p1641_p7 = pneg %p1640_p5 }
  0x37   : > { %p1646_p2 = pnand %p1645_p0, %p1641_p7 }
  0x39   : > { %1649 = shalt.err (!%p1646_p2)
}
  0x3a   : > { %s1650_s23 = scalar_lea.vmem %s1896_s17, 256  ;;  %s1738_s25 = smov [#allocation5]  }
  0x3b   : > { %p1651_p4 = scmp.ne.s32.totalorder %s1896_s17, %s1650_s23  ;;  %s1655_s7 = sshll.u32 %s1738_s25, 4  ;;  %s1656_s7 = int_to_ptr.vmem [resolvable:$false] %s1655_s7 }
  0x3c   : > { %s1657_s8 = scalar_lea.vmem %s1656_s7, 512  ;;  %p1658_p3 = scmp.lt.s32.totalorder %s1896_s17, %s1656_s7 }
  0x3d   : > { %p1653_p9 = pnand %p1651_p4, %p1611_p1  ;;  %p1659_p5 = scmp.lt.s32.totalorder %s1657_s8, %s1650_s23 }
  0x3f   : > { %p1654_p11 = pneg %p1653_p9  ;;  %p1660_p6 = por %p1659_p5, %p1658_p3 }
  0x41   : > { %p1661_p8 = pnand %p1660_p6, %p1654_p11 }
  0x43   : > { %1664 = shalt.err (!%p1661_p8)
}
  0x44   : > { %1411 = dma.hbm_to_vmem [thread:$0]  (!%p1845_p13), %s1892_s14, 256, %s1896_s17, %s139_s28, %s1736_s29, %s1736_s29, %s1737_s5  }
  0x45   : > { %161 = sbr.rel (%p1883_p12) target bundleno = 1249 (0x4e1), region = 28  ;;  %s1927_s16 = sand.u32 (!%p1883_p12), 1, %s1725_s10  }
  0x46   : > { %s1930_s30 = sshll.u32 (!%p1883_p12), %s1927_s16, 4  ;;  %s164_s4 = scalar_lea.sflag (!%p1883_p12), [#allocation3], %s1927_s16 }
  0x47   : > { %s167_s3 = scalar_lea.vmem (!%p1883_p12), [#allocation2], %s1930_s30  ;;  %p2756_p6 = scmp.ne.s32.totalorder (!%p1883_p12), %s2751_s20, 0 }
  0x4a   : > { %1708 = dma.done.wait (%p2756_p6), %s164_s4, 256  }
  0x4b   : > { %1710 = vsyncadd (%p2756_p6), %s164_s4, 4294967040  ;;  %s173_s29 = scalar_lea.sflag [#allocation6], %s1927_s16  ;;  %s176_s5 = scalar_lea.vmem [#allocation5], %s1930_s30 }
  0x4c   : > { %1712 = dma.done.wait (%p2756_p6), %s173_s29, 256  }
  0x4d   : > { %1714 = vsyncadd (%p2756_p6), %s173_s29, 4294967040  ;;  %v204_v0 = vlaneseq  ;;  %v1739_v1 = vmov 15   ;;  %v1740_v2 = vmov 0   ;;  %v1958_v7 = vld [vmem:[%s176_s5] sm:$0xff]  ;;  %v1960_v8 = vld [vmem:[%s176_s5 + $0x8] sm:$0xff]  ;;  %s1741_s20 = smov 1  }
  0x4e   : > { %1469 = vset.pattern.permute.xlu1 %v1739_v1  ;;  %1468 = vset.pattern.permute.xlu0 %v1740_v2  ;;  %v211_v9 = vrot.slane %v1958_v7, 7  ;;  %v212_v10 = vrot.slane %v1960_v8, 7  ;;  %v223_v12 = vrot.slane %v1958_v7, 1  ;;  %v224_v13 = vrot.slane %v1960_v8, 1  ;;  %s1742_s6 = smov 127   ;;  %s1744_s14 = smov 126  }
  0x4f   : > { %v1947_v3 = vshrl.u32 %v204_v0, 7  ;;  %255 = vperm.xlu1 %1469, %v1958_v7   ;;  %242 = vperm.xlu0 %1468, %v1958_v7   ;;  %v2022_v35 = vand.u32 127, %v204_v0  ;;  %v1743_v62 = vmov 0.0   ;;  %s1745_s17 = smov 2   ;;  %s1746_s28 = smov 125  }
  0x50   : > { %s1747_s19 = smov 3   ;;  %s1748_s24 = smov 12  }
  0x51   : > { %v1950_v4 = vsub.s32 0, %v1947_v3  ;;  %v1953_v5 = vadd.s32 8, %v1947_v3  ;;  %v1956_v6 = vsub.s32 7, %v1947_v3  ;;  %vm213_vm0 = vcmp.lt.s32.totalorder %v1947_v3, 1  ;;  %s1749_s26 = smov 18   ;;  %s1750_s27 = smov 6  }
  0x52   : > { %vm225_vm1 = vcmp.lt.s32.totalorder %v1947_v3, 7  ;;  %v215_v15 = vsel %vm213_vm0, %v212_v10, %v211_v9  ;;  %v214_v16 = vsel %vm213_vm0, %v211_v9, %v212_v10  ;;  %vm240_vm9 = vcmp.lt.s32.totalorder %v2022_v35, 1  ;;  %s1751_s23 = smov 122   ;;  %s1752_s25 = smov 116  }
  0x53   : > { %v220_v11 = vrot.slane %v1958_v7, %v1950_v4  ;;  %vm229_vm2 = vcmp.gt.s32.totalorder %v1953_v5, 14  ;;  %v233_v14 = vrot.slane %v1960_v8, %v1956_v6  ;;  %v226_v18 = vsel %vm225_vm1, %v223_v12, %v224_v13  ;;  %258 = vperm.xlu1 %1469, %v1960_v8   ;;  %245 = vperm.xlu0 %1468, %v1960_v8   ;;  %s201_s7 = scalar_lea.vmem [#allocation7], %s1930_s30  ;;  %s1398_s4 = sshll.u32 %s1792_s13, 8 }
  0x54   : > { %v227_v19 = vsel %vm225_vm1, %v224_v13, %v223_v12  ;;  %vm253_vm10 = vcmp.gt.s32.totalorder %v2022_v35, 14  ;;  %s1272_s8 = sshll.u32 %s201_s7, 4  ;;  %s2702_s30 = scalar_lea.hbm %s2747_s2, %s1398_s4  ;;  %s2697_s8 = int_to_ptr.vmem [resolvable:$true] %s1272_s8 }
  0x55   : > { %v221_v17 = vsel %vm213_vm0, %v220_v11, %v215_v15  ;;  %v235_v20 = vsel %vm229_vm2, %v233_v14, %v227_v19  ;;  %s1259_s5 = scalar_lea.sflag [#allocation4], %s1927_s16  ;;  %p2757_p1 = scmp.ne.s32.totalorder %s2752_s21, 0 }
  0x56   : > { %vm278_vm3 = vcmp.lt.s32.totalorder %v221_v17, %v226_v18  ;;  %vm280_vm4 = vcmp.lt.s32.totalorder %v214_v16, %v235_v20  ;;  %vm264_vm7 = vcmp.gt.s32.totalorder %v214_v16, %v235_v20  ;;  %vm262_vm8 = vcmp.gt.s32.totalorder %v221_v17, %v226_v18  ;;  %s1753_s13 = smov [#allocation7]  }
  0x57   : > { %v279_v21 = vsel %vm278_vm3, %v221_v17, %v226_v18  ;;  %v281_v22 = vsel %vm280_vm4, %v214_v16, %v235_v20  ;;  %236 = vrot.lane.b32.xlu1 %v1958_v7, %s1741_s20  ;;  %v265_v25 = vsel %vm264_vm7, %v214_v16, %v235_v20  ;;  %v263_v26 = vsel %vm262_vm8, %v221_v17, %v226_v18 }
  0x58   : > { %vm282_vm5 = vcmp.lt.s32.totalorder %v279_v21, %v1958_v7  ;;  %vm284_vm6 = vcmp.lt.s32.totalorder %v281_v22, %v1960_v8  ;;  %1470 = vset.pattern.permute.xlu1 %v1740_v2  ;;  %vm350_vm7 = vcmp.lt.s32.totalorder %v1947_v3, 2  ;;  %vm358_vm8 = vcmp.lt.s32.totalorder %v1947_v3, 6 }
  0x59   : > { %v1991_v23 = vsel %vm282_vm5, %v279_v21, %v1958_v7  ;;  %v1999_v24 = vsel %vm284_vm6, %v281_v22, %v1960_v8 }
  0x5a   : > { %291 = vperm.xlu0 %1468, %v1991_v23  }
  0x5b   : > { %294 = vperm.xlu1 %1470, %v1999_v24  }
  0x5e   : > { %1471 = vset.pattern.permute.xlu0 %v1739_v1 }
  0x5f   : > { %303 = vperm.xlu0 %1471, %v1991_v23   ;;  %1472 = vset.pattern.permute.xlu1 %v1739_v1 }
  0x60   : > { %306 = vperm.xlu1 %1472, %v1999_v24  }
  0x63   : > { %238 = vrot.lane.b32.xlu0 %v1960_v8, %s1741_s20 }
  0x64   : > { %249 = vrot.lane.b32.xlu1 %v1958_v7, %s1742_s6 }
  0x65   : > { %1473 = vset.pattern.permute.xlu1 %v1740_v2 }
  0x67   : > { %251 = vrot.lane.b32.xlu0 %v1960_v8, %s1742_s6 }
  0x68   : > { %286 = vrot.lane.b32.xlu1 %v1991_v23, %s1741_s20 }
  0x6b   : > { %288 = vrot.lane.b32.xlu0 %v1999_v24, %s1741_s20 }
  0x6c   : > { %298 = vrot.lane.b32.xlu1 %v1991_v23, %s1742_s6 }
  0x6f   : > { %300 = vrot.lane.b32.xlu0 %v1999_v24, %s1742_s6 }
  0xca   : > { %v256_v27 = vpop.permute.xlu1 %255  ;;  %v243_v28 = vpop.permute.xlu0 %242 }
  0xce   : > { %v259_v29 = vpop.permute.xlu1 %258  ;;  %v246_v30 = vpop.permute.xlu0 %245 }
  0xd2   : > { %v237_v31 = vpop.permute.xlu1 %236 }
  0xd3   : > { %v247_v40 = vsel %vm240_vm9, %v243_v28, %v237_v31 }
  0xd5   : > { %v292_v32 = vpop.permute.xlu0 %291 }
  0xd6   : > { %v295_v33 = vpop.permute.xlu1 %294 }
  0xda   : > { %v304_v34 = vpop.permute.xlu0 %303 }
  0xdb   : > { %v307_v37 = vpop.permute.xlu1 %306 }
  0xde   : > { %v239_v36 = vpop.permute.xlu0 %238 }
  0xdf   : > { %v250_v39 = vpop.permute.xlu1 %249  ;;  %v248_v41 = vsel %vm240_vm9, %v246_v30, %v239_v36 }
  0xe0   : > { %v260_v43 = vsel %vm253_vm10, %v256_v27, %v250_v39 }
  0xe1   : > { %vm266_vm12 = vcmp.gt.s32.totalorder %v247_v40, %v260_v43 }
  0xe2   : > { %v252_v38 = vpop.permute.xlu0 %251  ;;  %v267_v45 = vsel %vm266_vm12, %v247_v40, %v260_v43 }
  0xe3   : > { %v261_v42 = vsel %vm253_vm10, %v259_v29, %v252_v38  ;;  %vm270_vm14 = vcmp.gt.s32.totalorder %v263_v26, %v267_v45  ;;  %v287_v47 = vpop.permute.xlu1 %286 }
  0xe4   : > { %vm268_vm11 = vcmp.gt.s32.totalorder %v248_v41, %v261_v42  ;;  %v271_v49 = vsel %vm270_vm14, %v263_v26, %v267_v45  ;;  %v296_v53 = vsel %vm240_vm9, %v292_v32, %v287_v47  ;;  %vm371_vm14 = vcmp.lt.s32.totalorder %v1947_v3, 3 }
  0xe5   : > { %v269_v44 = vsel %vm268_vm11, %v248_v41, %v261_v42  ;;  %vm274_vm3 = vcmp.gt.s32.totalorder %v271_v49, %v1958_v7 }
  0xe6   : > { %vm272_vm13 = vcmp.gt.s32.totalorder %v265_v25, %v269_v44  ;;  %v289_v46 = vpop.permute.xlu0 %288  ;;  %v275_v60 = vsel %vm274_vm3, %v271_v49, %v1958_v7  ;;  %vm435_vm3 = vcmp.gt.s32.totalorder %v2022_v35, 13 }
  0xe7   : > { %v273_v48 = vsel %vm272_vm13, %v265_v25, %v269_v44  ;;  %v299_v51 = vpop.permute.xlu1 %298  ;;  %v297_v52 = vsel %vm240_vm9, %v295_v33, %v289_v46  ;;  %vm362_vm13 = vcmp.gt.s32.totalorder %v1953_v5, 13 }
  0xe8   : > { %v308_v55 = vsel %vm253_vm10, %v304_v34, %v299_v51  ;;  %vm276_vm15 = vcmp.gt.s32.totalorder %v273_v48, %v1960_v8 }
  0xe9   : > { %vm310_vm5 = vcmp.lt.s32.totalorder %v296_v53, %v308_v55  ;;  %v277_v58 = vsel %vm276_vm15, %v273_v48, %v1960_v8  ;;  %vm383_vm15 = vcmp.gt.s32.totalorder %v1953_v5, 12 }
  0xea   : > { %v301_v50 = vpop.permute.xlu0 %300  ;;  %v311_v57 = vsel %vm310_vm5, %v296_v53, %v308_v55  ;;  %vm379_vm5 = vcmp.lt.s32.totalorder %v1947_v3, 5 }
  0xeb   : > { %v309_v54 = vsel %vm253_vm10, %v307_v37, %v301_v50  ;;  %vm314_vm11 = vcmp.lt.s32.totalorder %v311_v57, %v1991_v23 }
  0xec   : > { %vm312_vm4 = vcmp.lt.s32.totalorder %v297_v52, %v309_v54  ;;  %v315_v61 = vsel %vm314_vm11, %v311_v57, %v1991_v23  ;;  %vm453_vm11 = vcmp.gt.s32.totalorder %v2022_v35, 12 }
  0xed   : > { %v313_v56 = vsel %vm312_vm4, %v297_v52, %v309_v54  ;;  %vm318_vm4 = vcmp.ne.s32.totalorder %v275_v60, %v315_v61 }
  0xee   : > { %vm316_vm6 = vcmp.lt.s32.totalorder %v313_v56, %v1999_v24  ;;  %v2060_v0 = vsel %vm318_vm4, 1.0, %v1743_v62 }
  0xef   : > { %v317_v59 = vsel %vm316_vm6, %v313_v56, %v1999_v24  ;;  %v324_v14 = vrot.slane %v2060_v0, 7  ;;  %v331_v15 = vrot.slane %v2060_v0, %v1950_v4  ;;  %v334_v16 = vrot.slane %v2060_v0, 1 }
  0xf0   : > { %vm319_vm12 = vcmp.ne.s32.totalorder %v277_v58, %v317_v59  ;;  %v348_v17 = vrot.slane %v2060_v0, 6  ;;  %v356_v18 = vrot.slane %v2060_v0, 2  ;;  %v369_v21 = vrot.slane %v2060_v0, 5 }
  0xf1   : > { %v2055_v63 = vsel %vm319_vm12, 1.0, %v1743_v62  ;;  %v377_v22 = vrot.slane %v2060_v0, 3  ;;  %vm428_vm6 = vcmp.lt.s32.totalorder %v2022_v35, 2  ;;  %vm446_vm12 = vcmp.lt.s32.totalorder %v2022_v35, 3 }
  0xf2   : > { %v325_v7 = vrot.slane %v2055_v63, 7  ;;  %v335_v8 = vrot.slane %v2055_v63, 1  ;;  %v341_v9 = vrot.slane %v2055_v63, %v1956_v6  ;;  %v349_v10 = vrot.slane %v2055_v63, 6 }
  0xf3   : > { %v357_v11 = vrot.slane %v2055_v63, 2  ;;  %v370_v12 = vrot.slane %v2055_v63, 5  ;;  %v378_v13 = vrot.slane %v2055_v63, 3 }
  0xf4   : > { %v326_v19 = vsel %vm213_vm0, %v324_v14, %v325_v7  ;;  %v327_v20 = vsel %vm213_vm0, %v325_v7, %v324_v14  ;;  %v336_v24 = vsel %vm225_vm1, %v334_v16, %v335_v8  ;;  %v337_v25 = vsel %vm225_vm1, %v335_v8, %v334_v16 }
  0xf5   : > { %v332_v23 = vsel %vm213_vm0, %v331_v15, %v327_v20  ;;  %v351_v26 = vsel %vm350_vm7, %v348_v17, %v349_v10  ;;  %v343_v27 = vsel %vm229_vm2, %v341_v9, %v337_v25  ;;  %v352_v29 = vsel %vm350_vm7, %v349_v10, %v348_v17 }
  0xf6   : > { %v344_v28 = vmax.f32 %v332_v23, %v336_v24  ;;  %v359_v30 = vsel %vm358_vm8, %v356_v18, %v357_v11  ;;  %v345_v31 = vmax.f32 %v326_v19, %v343_v27  ;;  %v354_v32 = vsel %vm350_vm7, %v331_v15, %v352_v29 }
  0xf7   : > { %v360_v33 = vsel %vm358_vm8, %v357_v11, %v356_v18  ;;  %v372_v34 = vsel %vm371_vm14, %v369_v21, %v370_v12  ;;  %v365_v38 = vmax.f32 %v354_v32, %v359_v30  ;;  %v373_v39 = vsel %vm371_vm14, %v370_v12, %v369_v21 }
  0xf8   : > { %v2103_v36 = vmax.f32 %v2060_v0, %v344_v28  ;;  %v364_v37 = vsel %vm362_vm13, %v341_v9, %v360_v33  ;;  %v2110_v40 = vmax.f32 %v2055_v63, %v345_v31  ;;  %v375_v42 = vsel %vm371_vm14, %v331_v15, %v373_v39 }
  0xf9   : > { %v366_v41 = vmax.f32 %v351_v26, %v364_v37  ;;  %v380_v43 = vsel %vm379_vm5, %v377_v22, %v378_v13  ;;  %v381_v45 = vsel %vm379_vm5, %v378_v13, %v377_v22 }
  0xfa   : > { %v2117_v44 = vmax.f32 %v2103_v36, %v365_v38  ;;  %v386_v46 = vmax.f32 %v375_v42, %v380_v43  ;;  %v385_v48 = vsel %vm383_vm15, %v341_v9, %v381_v45 }
  0xfb   : > { %v2122_v47 = vmax.f32 %v2110_v40, %v366_v41  ;;  %v387_v49 = vmax.f32 %v372_v34, %v385_v48 }
  0xfc   : > { %v388_v50 = vmax.f32 %v2117_v44, %v386_v46 }
  0xfd   : > { %v389_v51 = vmax.f32 %v2122_v47, %v387_v49  ;;  %v2136_v53 = vpack.i.bf16 %v2122_v47, %v2117_v44 }
  0xff   : > { %v1479_v52 = vpack.i.bf16 %v389_v51, %v388_v50 }
 0x101   : > { %1480 = vperm.xlu0 %1471, %v1479_v52   ;;  %1475 = vperm.xlu1 %1473, %v1479_v52  }
 0x105   : > { %1490 = vrot.lane.b32.xlu0 %v1479_v52, %s1742_s6  ;;  %1485 = vrot.lane.b32.xlu1 %v1479_v52, %s1741_s20 }
 0x106   : > { %1514 = vset.pattern.permute.xlu0 %v1740_v2  ;;  %1520 = vset.pattern.permute.xlu1 %v1739_v1 }
 0x109   : > { %1500 = vrot.lane.b32.xlu0 %v1479_v52, %s1744_s14  ;;  %1495 = vrot.lane.b32.xlu1 %v1479_v52, %s1745_s17 }
 0x10d   : > { %1510 = vrot.lane.b32.xlu0 %v1479_v52, %s1746_s28  ;;  %1505 = vrot.lane.b32.xlu1 %v1479_v52, %s1747_s19 }
 0x111   : > { %1516 = vperm.xlu0 %1514, %v2136_v53   ;;  %1522 = vperm.xlu1 %1520, %v2136_v53  }
 0x115   : > { %1527 = vrot.lane.b32.xlu0 %v2136_v53, %s1741_s20 }
 0x17c   : > { %v1481_v54 = vpop.permute.xlu0 %1480  ;;  %v1476_v55 = vpop.permute.xlu1 %1475 }
 0x17d   : > { %v1483_v56 = vunpack.i.h.bf16 %v1481_v54  ;;  %v1482_v57 = vunpack.i.l.bf16 %v1481_v54  ;;  %v1478_v58 = vunpack.i.h.bf16 %v1476_v55  ;;  %v1477_v59 = vunpack.i.l.bf16 %v1476_v55 }
 0x180   : > { %v1491_v60 = vpop.permute.xlu0 %1490  ;;  %v1486_v61 = vpop.permute.xlu1 %1485 }
 0x181   : > { %v1493_v7 = vunpack.i.h.bf16 %v1491_v60  ;;  %v1492_v8 = vunpack.i.l.bf16 %v1491_v60  ;;  %v1488_v9 = vunpack.i.h.bf16 %v1486_v61  ;;  %v1487_v10 = vunpack.i.l.bf16 %v1486_v61 }
 0x183   : > { %v418_v11 = vsel %vm253_vm10, %v1482_v57, %v1492_v8  ;;  %v419_v12 = vsel %vm253_vm10, %v1483_v56, %v1493_v7  ;;  %v404_v13 = vsel %vm240_vm9, %v1477_v59, %v1487_v10  ;;  %v405_v14 = vsel %vm240_vm9, %v1478_v58, %v1488_v9  ;;  %v2180_v7 = vld [vmem:[%s167_s3] sm:$0xff]  ;;  %v2184_v8 = vld [vmem:[%s167_s3 + $0x8] sm:$0xff] }
 0x184   : > { %v1501_v15 = vpop.permute.xlu0 %1500  ;;  %v1496_v16 = vpop.permute.xlu1 %1495  ;;  %v420_v21 = vmax.f32 %v404_v13, %v418_v11  ;;  %v421_v22 = vmax.f32 %v405_v14, %v419_v12 }
 0x185   : > { %v1503_v17 = vunpack.i.h.bf16 %v1501_v15  ;;  %v1502_v18 = vunpack.i.l.bf16 %v1501_v15  ;;  %v1498_v19 = vunpack.i.h.bf16 %v1496_v16  ;;  %v1497_v20 = vunpack.i.l.bf16 %v1496_v16 }
 0x186   : > { %v422_v37 = vmax.f32 %v388_v50, %v420_v21  ;;  %v423_v38 = vmax.f32 %v389_v51, %v421_v22 }
 0x187   : > { %v436_v23 = vsel %vm435_vm3, %v1482_v57, %v1502_v18  ;;  %v437_v24 = vsel %vm435_vm3, %v1483_v56, %v1503_v17  ;;  %v429_v25 = vsel %vm428_vm6, %v1477_v59, %v1497_v20  ;;  %v430_v26 = vsel %vm428_vm6, %v1478_v58, %v1498_v19 }
 0x188   : > { %v438_v27 = vmax.f32 %v429_v25, %v436_v23  ;;  %v439_v28 = vmax.f32 %v430_v26, %v437_v24  ;;  %v1511_v29 = vpop.permute.xlu0 %1510  ;;  %v1506_v30 = vpop.permute.xlu1 %1505 }
 0x189   : > { %v1513_v31 = vunpack.i.h.bf16 %v1511_v29  ;;  %v1512_v32 = vunpack.i.l.bf16 %v1511_v29  ;;  %v1508_v33 = vunpack.i.h.bf16 %v1506_v30  ;;  %v1507_v34 = vunpack.i.l.bf16 %v1506_v30 }
 0x18a   : > { %v440_v45 = vmax.f32 %v422_v37, %v438_v27  ;;  %v441_v46 = vmax.f32 %v423_v38, %v439_v28 }
 0x18b   : > { %v454_v39 = vsel %vm453_vm11, %v1482_v57, %v1512_v32  ;;  %v455_v41 = vsel %vm453_vm11, %v1483_v56, %v1513_v31  ;;  %v447_v42 = vsel %vm446_vm12, %v1477_v59, %v1507_v34  ;;  %v448_v43 = vsel %vm446_vm12, %v1478_v58, %v1508_v33 }
 0x18c   : > { %v456_v48 = vmax.f32 %v447_v42, %v454_v39  ;;  %v457_v49 = vmax.f32 %v448_v43, %v455_v41  ;;  %v1523_v38 = vpop.permute.xlu1 %1522 }
 0x18e   : > { %v458_v52 = vmax.f32 %v440_v45, %v456_v48  ;;  %v459_v54 = vmax.f32 %v441_v46, %v457_v49 }
 0x190   : > { %vm460_vm13 = vcmp.eq.f32.partialorder %v458_v52, 0.0  ;;  %vm461_vm14 = vcmp.eq.f32.partialorder %v459_v54, 0.0 }
 0x191   : > { %v2163_v55 = vsel %vm460_vm13, 1.0, %v1743_v62  ;;  %v2166_v50 = vsel %vm461_vm14, 1.0, %v1743_v62 }
 0x192   : > { %v492_v51 = vrot.slane %v2163_v55, 7  ;;  %v493_v56 = vrot.slane %v2166_v50, 7  ;;  %v504_v57 = vrot.slane %v2163_v55, 1  ;;  %v505_v58 = vrot.slane %v2166_v50, 1 }
 0x193   : > { %v511_v60 = vrot.slane %v2166_v50, %v1956_v6  ;;  %v499_v61 = vrot.slane %v2163_v55, %v1950_v4  ;;  %v466_v14 = vmul.f32 %v2163_v55, %v2180_v7  ;;  %v467_v15 = vmul.f32 %v2166_v50, %v2184_v8 }
 0x194   : > { %v494_v59 = vsel %vm213_vm0, %v492_v51, %v493_v56  ;;  %v507_v10 = vsel %vm225_vm1, %v505_v58, %v504_v57  ;;  %v495_v11 = vsel %vm213_vm0, %v493_v56, %v492_v51  ;;  %v506_v22 = vsel %vm225_vm1, %v504_v57, %v505_v58 }
 0x195   : > { %v503_v9 = vadd.f32 %v2166_v50, %v494_v59  ;;  %v513_v12 = vsel %vm229_vm2, %v511_v60, %v507_v10  ;;  %v500_v16 = vsel %vm213_vm0, %v499_v61, %v495_v11  ;;  %v468_v18 = vrot.slane %v466_v14, 7 }
 0x196   : > { %v502_v17 = vadd.f32 %v2163_v55, %v500_v16  ;;  %v469_v19 = vrot.slane %v467_v15, 7  ;;  %v480_v20 = vrot.slane %v466_v14, 1  ;;  %v481_v21 = vrot.slane %v467_v15, 1 }
 0x197   : > { %v2193_v13 = vadd.f32 %v513_v12, %v503_v9  ;;  %v487_v25 = vrot.slane %v467_v15, %v1956_v6  ;;  %v475_v26 = vrot.slane %v466_v14, %v1950_v4  ;;  %vm594_vm11 = vcmp.eq.f32.partialorder %v2163_v55, 0.0 }
 0x198   : > { %v514_v23 = vadd.f32 %v506_v22, %v502_v17  ;;  %v470_v24 = vsel %vm213_vm0, %v468_v18, %v469_v19  ;;  %v483_v27 = vsel %vm225_vm1, %v481_v21, %v480_v20  ;;  %v471_v28 = vsel %vm213_vm0, %v469_v19, %v468_v18 }
 0x199   : > { %577 = vperm.xlu1 %1520, %v2193_v13   ;;  %561 = vperm.xlu0 %1514, %v2193_v13   ;;  %v479_v29 = vadd.f32 %v470_v24, %v467_v15  ;;  %v489_v30 = vsel %vm229_vm2, %v487_v25, %v483_v27  ;;  %v476_v31 = vsel %vm213_vm0, %v475_v26, %v471_v28  ;;  %v1524_v17 = vunpack.i.l.bf16 %v1523_v38 }
 0x19a   : > { %v478_v33 = vadd.f32 %v476_v31, %v466_v14  ;;  %v482_v34 = vsel %vm225_vm1, %v480_v20, %v481_v21  ;;  %v1525_v14 = vunpack.i.h.bf16 %v1523_v38 }
 0x19b   : > { %v2227_v32 = vadd.f32 %v489_v30, %v479_v29 }
 0x19c   : > { %v2234_v37 = vadd.f32 %v482_v34, %v478_v33 }
 0x19d   : > { %552 = vrot.lane.b32.xlu1 %v2193_v13, %s1741_s20  ;;  %1539 = vrot.lane.b32.xlu0 %v2136_v53, %s1745_s17 }
 0x19e   : > { %1531 = vset.pattern.permute.xlu1 %v1740_v2 }
 0x1a1   : > { %570 = vrot.lane.b32.xlu1 %v2193_v13, %s1742_s6  ;;  %550 = vrot.lane.b32.xlu0 %v514_v23, %s1741_s20 }
 0x1a5   : > { %556 = vperm.xlu1 %1531, %v514_v23   ;;  %568 = vrot.lane.b32.xlu0 %v514_v23, %s1742_s6 }
 0x1a9   : > { %1532 = vset.pattern.permute.xlu1 %v1739_v1  ;;  %518 = vrot.lane.b32.xlu0 %v2227_v32, %s1741_s20 }
 0x1aa   : > { %573 = vperm.xlu1 %1532, %v514_v23  }
 0x1ad   : > { %522 = vperm.xlu0 %1514, %v2234_v37  }
 0x1ae   : > { %1534 = vrot.lane.b32.xlu1 %v2136_v53, %s1742_s6 }
 0x1af   : > { %1548 = vset.pattern.permute.xlu1 %v1740_v2 }
 0x1b1   : > { %1550 = vset.pattern.permute.xlu0 %v1739_v1 }
 0x1b2   : > { %1544 = vrot.lane.b32.xlu1 %v2136_v53, %s1744_s14  ;;  %539 = vperm.xlu0 %1550, %v2234_v37   ;;  %v1517_v53 = vpop.permute.xlu0 %1516 }
 0x1b3   : > { %v1519_v11 = vunpack.i.h.bf16 %v1517_v53  ;;  %v1518_v12 = vunpack.i.l.bf16 %v1517_v53 }
 0x1b6   : > { %536 = vrot.lane.b32.xlu0 %v2227_v32, %s1742_s6  ;;  %527 = vperm.xlu1 %1548, %v2227_v32   ;;  %v1528_v39 = vpop.permute.xlu0 %1527 }
 0x1b7   : > { %1552 = vset.pattern.permute.xlu0 %v1740_v2  ;;  %v1530_v60 = vunpack.i.h.bf16 %v1528_v39  ;;  %v1529_v61 = vunpack.i.l.bf16 %v1528_v39 }
 0x1b9   : > { %v612_v21 = vsel %vm240_vm9, %v1518_v12, %v1529_v61  ;;  %v613_v22 = vsel %vm240_vm9, %v1519_v11, %v1530_v60 }
 0x1ba   : > { %1549 = vset.pattern.permute.xlu1 %v1739_v1 }
 0x1bb   : > { %543 = vperm.xlu1 %1549, %v2227_v32  }
 0x1bf   : > { %516 = vrot.lane.b32.xlu1 %v2234_v37, %s1741_s20 }
 0x1c0   : > { %1551 = vset.pattern.permute.xlu1 %v1740_v2 }
 0x1c3   : > { %534 = vrot.lane.b32.xlu1 %v2234_v37, %s1742_s6 }
 0x214   : > { %v578_v41 = vpop.permute.xlu1 %577  ;;  %v562_v42 = vpop.permute.xlu0 %561 }
 0x218   : > { %v553_v43 = vpop.permute.xlu1 %552  ;;  %v1540_v45 = vpop.permute.xlu0 %1539 }
 0x219   : > { %v565_v49 = vsel %vm240_vm9, %v562_v42, %v553_v43  ;;  %v1542_v24 = vunpack.i.h.bf16 %v1540_v45  ;;  %v1541_v25 = vunpack.i.l.bf16 %v1540_v45 }
 0x21a   : > { %v567_v56 = vadd.f32 %v565_v49, %v2193_v13 }
 0x21b   : > { %v637_v34 = vsel %vm428_vm6, %v1519_v11, %v1542_v24  ;;  %v636_v53 = vsel %vm428_vm6, %v1518_v12, %v1541_v25 }
 0x21c   : > { %v571_v46 = vpop.permute.xlu1 %570  ;;  %v551_v48 = vpop.permute.xlu0 %550 }
 0x21d   : > { %v581_v51 = vsel %vm253_vm10, %v578_v41, %v571_v46 }
 0x21e   : > { %v2260_v57 = vadd.f32 %v581_v51, %v567_v56 }
 0x220   : > { %v557_v52 = vpop.permute.xlu1 %556  ;;  %v569_v54 = vpop.permute.xlu0 %568  ;;  %v587_v10 = vmax.f32 %v2260_v57, 1.0  ;;  %vm585_vm15 = vcmp.eq.f32.partialorder %v2260_v57, 0.0  ;;  %v1554_v57 = vpack.i.bf16 %v2110_v40, %v2103_v36 }
 0x221   : > { %v564_v9 = vsel %vm240_vm9, %v557_v52, %v551_v48 }
 0x222   : > { %v566_v13 = vadd.f32 %v564_v9, %v514_v23  ;;  %1593 = vrcp.f32 %v587_v10 }
 0x224   : > { %v519_v58 = vpop.permute.xlu0 %518 }
 0x225   : > { %v574_v59 = vpop.permute.xlu1 %573 }
 0x226   : > { %v580_v15 = vsel %vm253_vm10, %v574_v59, %v569_v54 }
 0x227   : > { %v2271_v26 = vadd.f32 %v580_v15, %v566_v13 }
 0x228   : > { %v523_v18 = vpop.permute.xlu0 %522 }
 0x229   : > { %v1535_v16 = vpop.permute.xlu1 %1534  ;;  %v586_v38 = vmax.f32 %v2271_v26, 1.0  ;;  %vm584_vm6 = vcmp.eq.f32.partialorder %v2271_v26, 0.0 }
 0x22a   : > { %v1537_v19 = vunpack.i.h.bf16 %v1535_v16  ;;  %v1536_v20 = vunpack.i.l.bf16 %v1535_v16 }
 0x22b   : > { %1595 = vrcp.f32 %v586_v38 }
 0x22c   : > { %v627_v27 = vsel %vm253_vm10, %v1525_v14, %v1537_v19  ;;  %v626_v23 = vsel %vm253_vm10, %v1524_v17, %v1536_v20 }
 0x22d   : > { %v629_v28 = vmax.f32 %v613_v22, %v627_v27  ;;  %v628_v29 = vmax.f32 %v612_v21, %v626_v23  ;;  %v1545_v30 = vpop.permute.xlu1 %1544  ;;  %v540_v42 = vpop.permute.xlu0 %539 }
 0x22e   : > { %v1547_v31 = vunpack.i.h.bf16 %v1545_v30  ;;  %v1546_v33 = vunpack.i.l.bf16 %v1545_v30 }
 0x22f   : > { %v631_v43 = vmax.f32 %v2122_v47, %v629_v28  ;;  %v630_v45 = vmax.f32 %v2117_v44, %v628_v29 }
 0x230   : > { %v643_v39 = vsel %vm435_vm3, %v1525_v14, %v1547_v31  ;;  %v642_v41 = vsel %vm435_vm3, %v1524_v17, %v1546_v33  ;;  %vm595_vm3 = vcmp.eq.f32.partialorder %v2166_v50, 0.0 }
 0x231   : > { %v644_v46 = vmax.f32 %v636_v53, %v642_v41  ;;  %v645_v48 = vmax.f32 %v637_v34, %v643_v39  ;;  %v528_v49 = vpop.permute.xlu1 %527  ;;  %v537_v47 = vpop.permute.xlu0 %536 }
 0x232   : > { %v531_v51 = vsel %vm240_vm9, %v528_v49, %v519_v58 }
 0x233   : > { %v646_v52 = vmax.f32 %v630_v45, %v644_v46  ;;  %v647_v54 = vmax.f32 %v631_v43, %v645_v48  ;;  %v533_v44 = vadd.f32 %v531_v51, %v2227_v32  ;;  %v1594_v32 = vpop.eup %1593 }
 0x235   : > { %vm648_vm4 = vcmp.eq.f32.partialorder %v646_v52, 0.0  ;;  %vm649_vm5 = vcmp.eq.f32.partialorder %v647_v54, 0.0 }
 0x236   : > { %v2291_v56 = vsel %vm648_vm4, 1.0, %v1743_v62  ;;  %v2294_v59 = vsel %vm649_vm5, 1.0, %v1743_v62  ;;  %v544_v60 = vpop.permute.xlu1 %543 }
 0x237   : > { %v547_v61 = vsel %vm253_vm10, %v544_v60, %v537_v47  ;;  %v680_v9 = vrot.slane %v2291_v56, 7  ;;  %v681_v58 = vrot.slane %v2294_v59, 7  ;;  %v692_v10 = vrot.slane %v2291_v56, 1 }
 0x238   : > { %v549_v11 = vadd.f32 %v547_v61, %v533_v44  ;;  %v693_v12 = vrot.slane %v2294_v59, 1  ;;  %v699_v14 = vrot.slane %v2294_v59, %v1956_v6  ;;  %v687_v15 = vrot.slane %v2291_v56, %v1950_v4  ;;  %v1596_v53 = vpop.eup %1595 }
 0x239   : > { %v682_v16 = vsel %vm213_vm0, %v680_v9, %v681_v58  ;;  %v683_v17 = vsel %vm213_vm0, %v681_v58, %v680_v9  ;;  %vm783_vm4 = vcmp.eq.f32.partialorder %v2294_v59, 0.0 }
 0x23a   : > { %v591_v13 = vmul.f32 %v1594_v32, %v549_v11  ;;  %v517_v19 = vpop.permute.xlu1 %516  ;;  %v691_v20 = vadd.f32 %v2294_v59, %v682_v16  ;;  %v695_v21 = vsel %vm225_vm1, %v693_v12, %v692_v10  ;;  %v688_v22 = vsel %vm213_vm0, %v687_v15, %v683_v17 }
 0x23b   : > { %v530_v24 = vsel %vm240_vm9, %v523_v18, %v517_v19  ;;  %v701_v25 = vsel %vm229_vm2, %v699_v14, %v695_v21  ;;  %v690_v27 = vadd.f32 %v2291_v56, %v688_v22  ;;  %v694_v28 = vsel %vm225_vm1, %v692_v10, %v693_v12 }
 0x23c   : > { %v2321_v23 = vadd.f32 %v701_v25, %v691_v20  ;;  %v593_v30 = vsel %vm585_vm15, %v2184_v8, %v591_v13  ;;  %v532_v31 = vadd.f32 %v530_v24, %v2234_v37  ;;  %vm782_vm15 = vcmp.eq.f32.partialorder %v2291_v56, 0.0 }
 0x23d   : > { %v2326_v29 = vadd.f32 %v694_v28, %v690_v27  ;;  %v2338_v38 = vsel %vm595_vm3, %v593_v30, %v2184_v8  ;;  %vm958_vm3 = vcmp.eq.f32.partialorder %v2060_v0, 0.0 }
 0x23e   : > { %749 = vperm.xlu0 %1552, %v2321_v23   ;;  %v535_v18 = vpop.permute.xlu1 %534  ;;  %v655_v37 = vmul.f32 %v2294_v59, %v2338_v38 }
 0x23f   : > { %v546_v33 = vsel %vm253_vm10, %v540_v42, %v535_v18  ;;  %744 = vperm.xlu1 %1551, %v2326_v29  }
 0x240   : > { %v548_v34 = vadd.f32 %v546_v33, %v532_v31  ;;  %v657_v42 = vrot.slane %v655_v37, 7  ;;  %v669_v45 = vrot.slane %v655_v37, 1  ;;  %v675_v49 = vrot.slane %v655_v37, %v1956_v6 }
 0x242   : > { %v589_v39 = vmul.f32 %v1596_v53, %v548_v34  ;;  %1555 = vperm.xlu0 %1552, %v1554_v57  }
 0x243   : > { %1553 = vset.pattern.permute.xlu1 %v1739_v1 }
 0x244   : > { %v592_v50 = vsel %vm584_vm6, %v2180_v7, %v589_v39  ;;  %761 = vperm.xlu1 %1553, %v2326_v29   ;;  %vm959_vm6 = vcmp.eq.f32.partialorder %v2055_v63, 0.0 }
 0x245   : > { %v2348_v41 = vsel %vm594_vm11, %v592_v50, %v2180_v7  ;;  %v2516_v0 = vsel %vm959_vm6, 1.0, %v1743_v62  ;;  %vm1219_vm6 = vcmp.gt.s32.totalorder %v2022_v35, 9 }
 0x246   : > { %v654_v8 = vmul.f32 %v2291_v56, %v2348_v41  ;;  %738 = vrot.lane.b32.xlu0 %v2326_v29, %s1741_s20 }
 0x248   : > { %765 = vperm.xlu1 %1553, %v2321_v23   ;;  %v656_v26 = vrot.slane %v654_v8, 7  ;;  %v668_v43 = vrot.slane %v654_v8, 1  ;;  %v663_v55 = vrot.slane %v654_v8, %v1950_v4 }
 0x24a   : > { %756 = vrot.lane.b32.xlu0 %v2326_v29, %s1742_s6  ;;  %v658_v7 = vsel %vm213_vm0, %v656_v26, %v657_v42  ;;  %v671_v46 = vsel %vm225_vm1, %v669_v45, %v668_v43  ;;  %v659_v48 = vsel %vm213_vm0, %v657_v42, %v656_v26  ;;  %v670_v60 = vsel %vm225_vm1, %v668_v43, %v669_v45 }
 0x24b   : > { %v667_v52 = vadd.f32 %v658_v7, %v655_v37  ;;  %v677_v54 = vsel %vm229_vm2, %v675_v49, %v671_v46  ;;  %v664_v51 = vsel %vm213_vm0, %v663_v55, %v659_v48 }
 0x24c   : > { %1560 = vperm.xlu1 %1553, %v1554_v57   ;;  %v666_v44 = vadd.f32 %v664_v51, %v654_v8 }
 0x24d   : > { %v2372_v47 = vadd.f32 %v677_v54, %v667_v52 }
 0x24e   : > { %1565 = vrot.lane.b32.xlu0 %v1554_v57, %s1741_s20  ;;  %v2381_v61 = vadd.f32 %v670_v60, %v666_v44 }
 0x250   : > { %740 = vrot.lane.b32.xlu1 %v2321_v23, %s1741_s20 }
 0x251   : > { %1574 = vset.pattern.permute.xlu1 %v1740_v2 }
 0x252   : > { %706 = vrot.lane.b32.xlu0 %v2372_v47, %s1741_s20 }
 0x254   : > { %758 = vrot.lane.b32.xlu1 %v2321_v23, %s1742_s6 }
 0x256   : > { %710 = vperm.xlu0 %1552, %v2381_v61  }
 0x258   : > { %1570 = vrot.lane.b32.xlu1 %v1554_v57, %s1742_s6 }
 0x25a   : > { %1576 = vset.pattern.permute.xlu0 %v1739_v1 }
 0x25b   : > { %727 = vperm.xlu0 %1576, %v2381_v61  }
 0x25c   : > { %715 = vperm.xlu1 %1574, %v2372_v47  }
 0x25f   : > { %724 = vrot.lane.b32.xlu0 %v2372_v47, %s1742_s6 }
 0x260   : > { %1575 = vset.pattern.permute.xlu1 %v1739_v1  ;;  %1578 = vset.pattern.permute.xlu0 %v1740_v2 }
 0x261   : > { %731 = vperm.xlu1 %1575, %v2372_v47  }
 0x265   : > { %704 = vrot.lane.b32.xlu1 %v2381_v61, %s1741_s20 }
 0x266   : > { %1577 = vset.pattern.permute.xlu1 %v1740_v2 }
 0x269   : > { %722 = vrot.lane.b32.xlu1 %v2381_v61, %s1742_s6 }
 0x2b9   : > { %v750_v9 = vpop.permute.xlu0 %749 }
 0x2ba   : > { %v745_v58 = vpop.permute.xlu1 %744 }
 0x2bd   : > { %v1556_v10 = vpop.permute.xlu0 %1555 }
 0x2be   : > { %v1558_v34 = vunpack.i.h.bf16 %v1556_v10  ;;  %v1557_v57 = vunpack.i.l.bf16 %v1556_v10 }
 0x2bf   : > { %v762_v11 = vpop.permute.xlu1 %761 }
 0x2c1   : > { %v739_v12 = vpop.permute.xlu0 %738 }
 0x2c2   : > { %v752_v13 = vsel %vm240_vm9, %v745_v58, %v739_v12 }
 0x2c3   : > { %v766_v14 = vpop.permute.xlu1 %765  ;;  %v754_v22 = vadd.f32 %v752_v13, %v2326_v29 }
 0x2c5   : > { %v757_v15 = vpop.permute.xlu0 %756 }
 0x2c6   : > { %v768_v21 = vsel %vm253_vm10, %v762_v11, %v757_v15 }
 0x2c7   : > { %v1561_v32 = vpop.permute.xlu1 %1560  ;;  %v2408_v28 = vadd.f32 %v768_v21, %v754_v22 }
 0x2c8   : > { %v1563_v37 = vunpack.i.h.bf16 %v1561_v32  ;;  %v1562_v50 = vunpack.i.l.bf16 %v1561_v32 }
 0x2c9   : > { %v1566_v16 = vpop.permute.xlu0 %1565  ;;  %vm772_vm5 = vcmp.eq.f32.partialorder %v2408_v28, 0.0 }
 0x2ca   : > { %v1568_v18 = vunpack.i.h.bf16 %v1566_v16  ;;  %v1567_v33 = vunpack.i.l.bf16 %v1566_v16 }
 0x2cb   : > { %v741_v17 = vpop.permute.xlu1 %740 }
 0x2cc   : > { %v753_v19 = vsel %vm240_vm9, %v750_v9, %v741_v17  ;;  %v800_v26 = vsel %vm240_vm9, %v1557_v57, %v1567_v33  ;;  %v801_v42 = vsel %vm240_vm9, %v1558_v34, %v1568_v18 }
 0x2cd   : > { %v707_v20 = vpop.permute.xlu0 %706  ;;  %v755_v24 = vadd.f32 %v753_v19, %v2321_v23  ;;  %v774_v23 = vmax.f32 %v2408_v28, 1.0 }
 0x2cf   : > { %v759_v25 = vpop.permute.xlu1 %758 }
 0x2d0   : > { %v769_v27 = vsel %vm253_vm10, %v766_v14, %v759_v25 }
 0x2d1   : > { %v771_v30 = vadd.f32 %v769_v27, %v755_v24  ;;  %v711_v31 = vpop.permute.xlu0 %710 }
 0x2d3   : > { %v775_v53 = vmax.f32 %v771_v30, 1.0  ;;  %v1571_v39 = vpop.permute.xlu1 %1570  ;;  %vm773_vm14 = vcmp.eq.f32.partialorder %v771_v30, 0.0 }
 0x2d4   : > { %v1573_v8 = vunpack.i.h.bf16 %v1571_v39  ;;  %v1572_v29 = vunpack.i.l.bf16 %v1571_v39 }
 0x2d5   : > { %1597 = vrcp.f32 %v775_v53 }
 0x2d6   : > { %v814_v43 = vsel %vm253_vm10, %v1562_v50, %v1572_v29  ;;  %v815_v45 = vsel %vm253_vm10, %v1563_v37, %v1573_v8  ;;  %v728_v46 = vpop.permute.xlu0 %727  ;;  %1599 = vrcp.f32 %v774_v23 }
 0x2d7   : > { %v816_v55 = vmax.f32 %v800_v26, %v814_v43  ;;  %v817_v7 = vmax.f32 %v801_v42, %v815_v45  ;;  %v716_v48 = vpop.permute.xlu1 %715 }
 0x2d8   : > { %v719_v44 = vsel %vm240_vm9, %v716_v48, %v707_v20 }
 0x2d9   : > { %v818_v49 = vmax.f32 %v2103_v36, %v816_v55  ;;  %v819_v52 = vmax.f32 %v2110_v40, %v817_v7  ;;  %v721_v15 = vadd.f32 %v719_v44, %v2372_v47 }
 0x2da   : > { %v725_v9 = vpop.permute.xlu0 %724 }
 0x2db   : > { %vm820_vm12 = vcmp.eq.f32.partialorder %v818_v49, 0.0  ;;  %vm821_vm13 = vcmp.eq.f32.partialorder %v819_v52, 0.0 }
 0x2dc   : > { %v2422_v54 = vsel %vm820_vm12, 1.0, %v1743_v62  ;;  %v2425_v51 = vsel %vm821_vm13, 1.0, %v1743_v62  ;;  %v732_v60 = vpop.permute.xlu1 %731 }
 0x2dd   : > { %v852_v58 = vrot.slane %v2422_v54, 7  ;;  %v853_v36 = vrot.slane %v2425_v51, 7  ;;  %v864_v40 = vrot.slane %v2422_v54, 1  ;;  %v735_v10 = vsel %vm253_vm10, %v732_v60, %v725_v9 }
 0x2de   : > { %v865_v11 = vrot.slane %v2425_v51, 1  ;;  %v871_v12 = vrot.slane %v2425_v51, %v1956_v6  ;;  %v859_v14 = vrot.slane %v2422_v54, %v1950_v4  ;;  %v737_v21 = vadd.f32 %v735_v10, %v721_v15 }
 0x2df   : > { %v854_v32 = vsel %vm213_vm0, %v852_v58, %v853_v36  ;;  %v855_v16 = vsel %vm213_vm0, %v853_v36, %v852_v58  ;;  %v2513_v60 = vsel %vm958_vm3, 1.0, %v1743_v62  ;;  %v991_v58 = vrot.slane %v2516_v0, 7 }
 0x2e0   : > { %v705_v17 = vpop.permute.xlu1 %704  ;;  %v863_v13 = vadd.f32 %v2425_v51, %v854_v32  ;;  %v867_v19 = vsel %vm225_vm1, %v865_v11, %v864_v40  ;;  %v860_v20 = vsel %vm213_vm0, %v859_v14, %v855_v16  ;;  %v866_v18 = vsel %vm225_vm1, %v864_v40, %v865_v11 }
 0x2e1   : > { %v718_v22 = vsel %vm240_vm9, %v711_v31, %v705_v17  ;;  %v873_v47 = vsel %vm229_vm2, %v871_v12, %v867_v19  ;;  %v862_v24 = vadd.f32 %v2422_v54, %v860_v20  ;;  %v990_v63 = vrot.slane %v2513_v60, 7 }
 0x2e2   : > { %v1598_v25 = vpop.eup %1597  ;;  %v2454_v27 = vadd.f32 %v873_v47, %v863_v13  ;;  %v720_v57 = vadd.f32 %v718_v22, %v2381_v61  ;;  %v1002_v36 = vrot.slane %v2513_v60, 1  ;;  %v1003_v40 = vrot.slane %v2516_v0, 1 }
 0x2e3   : > { %v779_v33 = vmul.f32 %v1598_v25, %v737_v21  ;;  %v2458_v34 = vadd.f32 %v866_v18, %v862_v24  ;;  %v1600_v8 = vpop.eup %1599  ;;  %v992_v62 = vsel %vm213_vm0, %v990_v63, %v991_v58  ;;  %v1009_v10 = vrot.slane %v2516_v0, %v1956_v6 }
 0x2e4   : > { %v723_v53 = vpop.permute.xlu1 %722  ;;  %921 = vperm.xlu0 %1578, %v2454_v27   ;;  %v997_v11 = vrot.slane %v2513_v60, %v1950_v4  ;;  %v1005_v12 = vsel %vm225_vm1, %v1003_v40, %v1002_v36  ;;  %v993_v14 = vsel %vm213_vm0, %v991_v58, %v990_v63  ;;  %v1001_v15 = vadd.f32 %v2516_v0, %v992_v62 }
 0x2e5   : > { %v781_v31 = vsel %vm773_vm14, %v2338_v38, %v779_v33  ;;  %v734_v39 = vsel %vm253_vm10, %v728_v46, %v723_v53  ;;  %916 = vperm.xlu1 %1577, %v2458_v34   ;;  %v1011_v32 = vsel %vm229_vm2, %v1009_v10, %v1005_v12  ;;  %v1004_v19 = vsel %vm225_vm1, %v1002_v36, %v1003_v40 }
 0x2e6   : > { %v2468_v37 = vsel %vm783_vm4, %v781_v31, %v2338_v38  ;;  %v736_v50 = vadd.f32 %v734_v39, %v720_v57  ;;  %v998_v16 = vsel %vm213_vm0, %v997_v11, %v993_v14  ;;  %v2550_v17 = vadd.f32 %v1011_v32, %v1001_v15 }
 0x2e7   : > { %v827_v59 = vmul.f32 %v2425_v51, %v2468_v37  ;;  %v1000_v13 = vadd.f32 %v2513_v60, %v998_v16  ;;  %vm955_vm13 = vcmp.eq.f32.partialorder %v2425_v51, 0.0  ;;  %vm954_vm14 = vcmp.eq.f32.partialorder %v2422_v54, 0.0 }
 0x2e8   : > { %v777_v30 = vmul.f32 %v1600_v8, %v736_v50  ;;  %910 = vrot.lane.b32.xlu0 %v2458_v34, %s1741_s20  ;;  %vm1114_vm4 = vcmp.lt.s32.totalorder %v1947_v3, 4  ;;  %vm1204_vm3 = vcmp.lt.s32.totalorder %v2022_v35, 6 }
 0x2e9   : > { %1579 = vset.pattern.permute.xlu1 %v1739_v1  ;;  %v829_v28 = vrot.slane %v827_v59, 7  ;;  %v841_v42 = vrot.slane %v827_v59, 1  ;;  %v847_v43 = vrot.slane %v827_v59, %v1956_v6  ;;  %v2559_v20 = vadd.f32 %v1004_v19, %v1000_v13 }
 0x2ea   : > { %v780_v61 = vsel %vm772_vm5, %v2348_v41, %v777_v30  ;;  %933 = vperm.xlu1 %1579, %v2458_v34   ;;  %vm1152_vm5 = vcmp.gt.s32.totalorder %v1947_v3, 3 }
 0x2eb   : > { %v2480_v38 = vsel %vm782_vm15, %v780_v61, %v2348_v41  ;;  %vm1141_vm15 = vcmp.gt.s32.totalorder %v1953_v5, 9 }
 0x2ec   : > { %v826_v29 = vmul.f32 %v2422_v54, %v2480_v38  ;;  %928 = vrot.lane.b32.xlu0 %v2458_v34, %s1742_s6 }
 0x2ee   : > { %937 = vperm.xlu1 %1579, %v2454_v27   ;;  %v828_v23 = vrot.slane %v826_v29, 7  ;;  %v840_v26 = vrot.slane %v826_v29, 1  ;;  %v835_v56 = vrot.slane %v826_v29, %v1950_v4 }
 0x2f0   : > { %v830_v41 = vsel %vm213_vm0, %v828_v23, %v829_v28  ;;  %v843_v45 = vsel %vm225_vm1, %v841_v42, %v840_v26  ;;  %v831_v55 = vsel %vm213_vm0, %v829_v28, %v828_v23  ;;  %v842_v44 = vsel %vm225_vm1, %v840_v26, %v841_v42 }
 0x2f1   : > { %v839_v7 = vadd.f32 %v830_v41, %v827_v59  ;;  %v849_v46 = vsel %vm229_vm2, %v847_v43, %v843_v45  ;;  %v836_v48 = vsel %vm213_vm0, %v835_v56, %v831_v55 }
 0x2f2   : > { %912 = vrot.lane.b32.xlu1 %v2454_v27, %s1741_s20  ;;  %v838_v52 = vadd.f32 %v836_v48, %v826_v29 }
 0x2f3   : > { %v2502_v49 = vadd.f32 %v849_v46, %v839_v7  ;;  %1580 = vset.pattern.permute.xlu1 %v1740_v2 }
 0x2f4   : > { %v2518_v9 = vadd.f32 %v842_v44, %v838_v52 }
 0x2f5   : > { %878 = vrot.lane.b32.xlu0 %v2502_v49, %s1741_s20 }
 0x2f6   : > { %930 = vrot.lane.b32.xlu1 %v2454_v27, %s1742_s6 }
 0x2f9   : > { %882 = vperm.xlu0 %1578, %v2518_v9  }
 0x2fa   : > { %887 = vperm.xlu1 %1580, %v2502_v49  }
 0x2fd   : > { %1582 = vset.pattern.permute.xlu0 %v1739_v1 }
 0x2fe   : > { %899 = vperm.xlu0 %1582, %v2518_v9   ;;  %1581 = vset.pattern.permute.xlu1 %v1739_v1 }
 0x2ff   : > { %903 = vperm.xlu1 %1581, %v2502_v49  }
 0x302   : > { %896 = vrot.lane.b32.xlu0 %v2502_v49, %s1742_s6 }
 0x303   : > { %876 = vrot.lane.b32.xlu1 %v2518_v9, %s1741_s20  ;;  %1584 = vset.pattern.permute.xlu0 %v1740_v2 }
 0x304   : > { %1583 = vset.pattern.permute.xlu1 %v1740_v2 }
 0x306   : > { %1059 = vperm.xlu0 %1584, %v2550_v17  }
 0x307   : > { %894 = vrot.lane.b32.xlu1 %v2518_v9, %s1742_s6 }
 0x30a   : > { %1048 = vrot.lane.b32.xlu0 %v2559_v20, %s1741_s20 }
 0x30b   : > { %1054 = vperm.xlu1 %1583, %v2559_v20  }
 0x30e   : > { %1066 = vrot.lane.b32.xlu0 %v2559_v20, %s1742_s6 }
 0x30f   : > { %1585 = vset.pattern.permute.xlu1 %v1739_v1 }
 0x310   : > { %1071 = vperm.xlu1 %1585, %v2559_v20  }
 0x314   : > { %1075 = vperm.xlu1 %1585, %v2550_v17  }
 0x318   : > { %1050 = vrot.lane.b32.xlu1 %v2550_v17, %s1741_s20 }
 0x319   : > { %1586 = vset.pattern.permute.xlu1 %v1740_v2 }
 0x31c   : > { %1068 = vrot.lane.b32.xlu1 %v2550_v17, %s1742_s6 }
 0x35f   : > { %v922_v21 = vpop.permute.xlu0 %921 }
 0x360   : > { %v917_v22 = vpop.permute.xlu1 %916 }
 0x363   : > { %v911_v47 = vpop.permute.xlu0 %910 }
 0x364   : > { %v924_v33 = vsel %vm240_vm9, %v917_v22, %v911_v47 }
 0x365   : > { %v934_v24 = vpop.permute.xlu1 %933  ;;  %v926_v31 = vadd.f32 %v924_v33, %v2458_v34 }
 0x367   : > { %v929_v18 = vpop.permute.xlu0 %928 }
 0x368   : > { %v940_v57 = vsel %vm253_vm10, %v934_v24, %v929_v18 }
 0x369   : > { %v938_v25 = vpop.permute.xlu1 %937  ;;  %v942_v50 = vadd.f32 %v940_v57, %v926_v31 }
 0x36b   : > { %v879_v8 = vpop.permute.xlu0 %878  ;;  %v946_v28 = vmax.f32 %v942_v50, 1.0  ;;  %vm944_vm12 = vcmp.eq.f32.partialorder %v942_v50, 0.0 }
 0x36d   : > { %v913_v53 = vpop.permute.xlu1 %912 }
 0x36e   : > { %v925_v39 = vsel %vm240_vm9, %v922_v21, %v913_v53 }
 0x36f   : > { %v927_v30 = vadd.f32 %v925_v39, %v2454_v27 }
 0x371   : > { %v931_v59 = vpop.permute.xlu1 %930 }
 0x372   : > { %v941_v61 = vsel %vm253_vm10, %v938_v25, %v931_v59 }
 0x373   : > { %v943_v29 = vadd.f32 %v941_v61, %v927_v30 }
 0x374   : > { %v883_v23 = vpop.permute.xlu0 %882 }
 0x375   : > { %v947_v26 = vmax.f32 %v943_v29, 1.0  ;;  %v888_v42 = vpop.permute.xlu1 %887  ;;  %vm945_vm11 = vcmp.eq.f32.partialorder %v943_v29, 0.0 }
 0x376   : > { %v891_v41 = vsel %vm240_vm9, %v888_v42, %v879_v8 }
 0x377   : > { %1601 = vrcp.f32 %v947_v26  ;;  %v893_v7 = vadd.f32 %v891_v41, %v2502_v49 }
 0x378   : > { %1603 = vrcp.f32 %v946_v28 }
 0x379   : > { %v900_v56 = vpop.permute.xlu0 %899 }
 0x37a   : > { %v904_v34 = vpop.permute.xlu1 %903 }
 0x37d   : > { %v897_v43 = vpop.permute.xlu0 %896 }
 0x37e   : > { %v877_v45 = vpop.permute.xlu1 %876  ;;  %v907_v55 = vsel %vm253_vm10, %v904_v34, %v897_v43 }
 0x37f   : > { %v890_v27 = vsel %vm240_vm9, %v883_v23, %v877_v45  ;;  %v909_v52 = vadd.f32 %v907_v55, %v893_v7 }
 0x380   : > { %v892_v46 = vadd.f32 %v890_v27, %v2518_v9 }
 0x381   : > { %v1060_v31 = vpop.permute.xlu0 %1059 }
 0x382   : > { %v895_v48 = vpop.permute.xlu1 %894 }
 0x383   : > { %v906_v44 = vsel %vm253_vm10, %v900_v56, %v895_v48 }
 0x384   : > { %v1602_v63 = vpop.eup %1601  ;;  %v908_v58 = vadd.f32 %v906_v44, %v892_v46 }
 0x385   : > { %v1604_v36 = vpop.eup %1603  ;;  %v951_v40 = vmul.f32 %v1602_v63, %v909_v52  ;;  %v1049_v50 = vpop.permute.xlu0 %1048 }
 0x386   : > { %v949_v62 = vmul.f32 %v1604_v36, %v908_v58  ;;  %v1055_v57 = vpop.permute.xlu1 %1054 }
 0x387   : > { %v953_v10 = vsel %vm945_vm11, %v2468_v37, %v951_v40  ;;  %v1062_v30 = vsel %vm240_vm9, %v1055_v57, %v1049_v50  ;;  %vm1238_vm11 = vcmp.gt.s32.totalorder %v2022_v35, 3 }
 0x388   : > { %v2597_v49 = vsel %vm955_vm13, %v953_v10, %v2468_v37  ;;  %v952_v9 = vsel %vm944_vm12, %v2480_v38, %v949_v62  ;;  %v1064_v23 = vadd.f32 %v1062_v30, %v2559_v20 }
 0x389   : > { %v965_v11 = vmul.f32 %v2516_v0, %v2597_v49  ;;  %v2604_v12 = vsel %vm954_vm14, %v952_v9, %v2480_v38  ;;  %v1067_v59 = vpop.permute.xlu0 %1066 }
 0x38a   : > { %v964_v14 = vmul.f32 %v2513_v60, %v2604_v12 }
 0x38b   : > { %v967_v15 = vrot.slane %v965_v11, 7  ;;  %v979_v51 = vrot.slane %v965_v11, 1  ;;  %v985_v13 = vrot.slane %v965_v11, %v1956_v6  ;;  %v1072_v53 = vpop.permute.xlu1 %1071 }
 0x38c   : > { %v966_v32 = vrot.slane %v964_v14, 7  ;;  %v978_v16 = vrot.slane %v964_v14, 1  ;;  %v973_v37 = vrot.slane %v964_v14, %v1950_v4  ;;  %v1078_v29 = vsel %vm253_vm10, %v1072_v53, %v1067_v59 }
 0x38d   : > { %v1080_v42 = vadd.f32 %v1078_v29, %v1064_v23 }
 0x38e   : > { %v968_v54 = vsel %vm213_vm0, %v966_v32, %v967_v15  ;;  %v981_v19 = vsel %vm225_vm1, %v979_v51, %v978_v16  ;;  %v969_v38 = vsel %vm213_vm0, %v967_v15, %v966_v32  ;;  %v980_v18 = vsel %vm225_vm1, %v978_v16, %v979_v51 }
 0x38f   : > { %v977_v21 = vadd.f32 %v968_v54, %v965_v11  ;;  %v987_v22 = vsel %vm229_vm2, %v985_v13, %v981_v19  ;;  %v974_v47 = vsel %vm213_vm0, %v973_v37, %v969_v38  ;;  %v1076_v39 = vpop.permute.xlu1 %1075  ;;  %v1084_v43 = vmax.f32 %v1080_v42, 1.0 }
 0x390   : > { %v976_v25 = vadd.f32 %v974_v47, %v964_v14  ;;  %vm1082_vm0 = vcmp.eq.f32.partialorder %v1080_v42, 0.0  ;;  %vm1092_vm1 = vcmp.eq.f32.partialorder %v2513_v60, 0.0 }
 0x391   : > { %v989_v24 = vadd.f32 %v987_v22, %v977_v21  ;;  %1605 = vrcp.f32 %v1084_v43 }
 0x392   : > { %v988_v33 = vadd.f32 %v980_v18, %v976_v25 }
 0x393   : > { %1025 = vperm.xlu1 %1586, %v989_v24   ;;  %v1051_v8 = vpop.permute.xlu1 %1050 }
 0x394   : > { %1020 = vperm.xlu0 %1584, %v988_v33   ;;  %v1063_v28 = vsel %vm240_vm9, %v1060_v31, %v1051_v8 }
 0x395   : > { %v1065_v56 = vadd.f32 %v1063_v28, %v2550_v17 }
 0x397   : > { %1587 = vset.pattern.permute.xlu1 %v1739_v1  ;;  %v1069_v61 = vpop.permute.xlu1 %1068 }
 0x398   : > { %1041 = vperm.xlu1 %1587, %v989_v24   ;;  %1588 = vset.pattern.permute.xlu0 %v1739_v1  ;;  %v1079_v26 = vsel %vm253_vm10, %v1076_v39, %v1069_v61 }
 0x399   : > { %1037 = vperm.xlu0 %1588, %v988_v33   ;;  %v1081_v34 = vadd.f32 %v1079_v26, %v1065_v56 }
 0x39b   : > { %v1085_v45 = vmax.f32 %v1081_v34, 1.0  ;;  %vm1083_vm2 = vcmp.eq.f32.partialorder %v1081_v34, 0.0 }
 0x39c   : > { %1014 = vrot.lane.b32.xlu1 %v988_v33, %s1741_s20 }
 0x39d   : > { %1589 = vset.pattern.permute.xlu1 %v1740_v2  ;;  %1016 = vrot.lane.b32.xlu0 %v989_v24, %s1741_s20  ;;  %1607 = vrcp.f32 %v1085_v45  ;;  %s1665_s20 = scalar_lea.vmem %s2697_s8, 256 }
 0x39e   : > { %v1606_v62 = vpop.eup %1605  ;;  %p1666_p13 = scmp.ne.s32.totalorder %s2697_s8, %s1665_s20 }
 0x3a0   : > { %1032 = vrot.lane.b32.xlu1 %v988_v33, %s1742_s6  ;;  %p1667_p12 = pnand %p1666_p13, %p2757_p1 }
 0x3a1   : > { %1034 = vrot.lane.b32.xlu0 %v989_v24, %s1742_s6  ;;  %s1669_s6 = sshll.u32 %s1753_s13, 4  ;;  %s1670_s6 = int_to_ptr.vmem [resolvable:$false] %s1669_s6 }
 0x3a2   : > { %p1668_p7 = pneg %p1667_p12  ;;  %s1671_s14 = scalar_lea.vmem %s1670_s6, 512 }
 0x3a3   : > { %p1672_p10 = scmp.lt.s32.totalorder %s2697_s8, %s1670_s6  ;;  %p1673_p0 = scmp.lt.s32.totalorder %s1671_s14, %s1665_s20 }
 0x3a5   : > { %p1674_p2 = por %p1673_p0, %p1672_p10 }
 0x3a7   : > { %p1675_p4 = pnand %p1674_p2, %p1668_p7 }
 0x3aa   : > { %v1608_v14 = vpop.eup %1607 }
 0x40e   : > { %v1026_v41 = vpop.permute.xlu1 %1025 }
 0x40f   : > { %v1021_v27 = vpop.permute.xlu0 %1020 }
 0x413   : > { %v1042_v55 = vpop.permute.xlu1 %1041 }
 0x414   : > { %v1038_v7 = vpop.permute.xlu0 %1037 }
 0x417   : > { %v1015_v46 = vpop.permute.xlu1 %1014 }
 0x418   : > { %v1028_v48 = vsel %vm240_vm9, %v1021_v27, %v1015_v46  ;;  %v1017_v20 = vpop.permute.xlu0 %1016 }
 0x419   : > { %v1029_v52 = vsel %vm240_vm9, %v1026_v41, %v1017_v20  ;;  %v1030_v44 = vadd.f32 %v1028_v48, %v988_v33  ;;  %vm1093_vm9 = vcmp.eq.f32.partialorder %v2516_v0, 0.0 }
 0x41a   : > { %v1031_v58 = vadd.f32 %v1029_v52, %v989_v24 }
 0x41b   : > { %v1033_v63 = vpop.permute.xlu1 %1032 }
 0x41c   : > { %v1044_v17 = vsel %vm253_vm10, %v1038_v7, %v1033_v63  ;;  %v1035_v40 = vpop.permute.xlu0 %1034 }
 0x41d   : > { %v1046_v36 = vadd.f32 %v1044_v17, %v1030_v44  ;;  %v1045_v10 = vsel %vm253_vm10, %v1042_v55, %v1035_v40  ;;  %vm1118_vm10 = vcmp.lt.s32.totalorder %v1953_v5, 12 }
 0x41e   : > { %v1047_v11 = vadd.f32 %v1045_v10, %v1031_v58 }
 0x41f   : > { %v1087_v9 = vmul.f32 %v1606_v62, %v1046_v36 }
 0x420   : > { %v1089_v51 = vmul.f32 %v1608_v14, %v1047_v11 }
 0x421   : > { %v1090_v15 = vsel %vm1082_vm0, %v2604_v12, %v1087_v9 }
 0x422   : > { %v1094_v32 = vsel %vm1092_vm1, %v1090_v15, %v2604_v12  ;;  %v1091_v13 = vsel %vm1083_vm2, %v2597_v49, %v1089_v51 }
 0x423   : > { %v1105_v16 = vrot.slane %v1094_v32, %v1950_v4  ;;  %v1112_v37 = vrot.slane %v1094_v32, 4  ;;  %v1125_v19 = vrot.slane %v1094_v32, 2  ;;  %v1095_v38 = vsel %vm1093_vm9, %v1091_v13, %v2597_v49 }
 0x424   : > { %v1113_v21 = vrot.slane %v1095_v38, 4  ;;  %v1126_v22 = vrot.slane %v1095_v38, 2  ;;  %v1096_v12 = vrot.slane %v1094_v32, 6  ;;  %v1097_v47 = vrot.slane %v1095_v38, 6 }
 0x425   : > { %v1121_v54 = vmul.f32 0.054005582, %v1105_v16  ;;  %v1108_v60 = vmul.f32 0.004433048, %v1105_v16  ;;  %v1145_v57 = vrot.slane %v1095_v38, %v1956_v6  ;;  %v1136_v8 = vmul.f32 0.39905027, %v1094_v32 }
 0x426   : > { %v1116_v24 = vsel %vm1114_vm4, %v1113_v21, %v1112_v37  ;;  %v1127_v0 = vsel %vm358_vm8, %v1125_v19, %v1126_v22  ;;  %v1128_v18 = vsel %vm358_vm8, %v1126_v22, %v1125_v19  ;;  %v1098_v31 = vsel %vm350_vm7, %v1096_v12, %v1097_v47 }
 0x427   : > { %v1120_v4 = vsel %vm1118_vm10, %v1105_v16, %v1116_v24  ;;  %v1123_v25 = vadd.f32 %v1121_v54, %v1108_v60  ;;  %v1130_v49 = vsel %vm358_vm8, %v1105_v16, %v1128_v18  ;;  %v1133_v50 = vmul.f32 0.24203622, %v1127_v0 }
 0x428   : > { %v1122_v33 = vmul.f32 0.054005582, %v1120_v4  ;;  %v1132_v53 = vmul.f32 0.24203622, %v1130_v49  ;;  %v1099_v59 = vsel %vm350_vm7, %v1097_v47, %v1096_v12  ;;  %v1154_v29 = vsel %vm1152_vm5, %v1145_v57, %v1116_v24 }
 0x429   : > { %v1148_v23 = vmul.f32 0.24203622, %v1098_v31  ;;  %v1137_v6 = vmul.f32 0.39905027, %v1095_v38  ;;  %v1147_v26 = vsel %vm1141_vm15, %v1145_v57, %v1099_v59  ;;  %v1156_v56 = vmul.f32 0.054005582, %v1154_v29 }
 0x42a   : > { %v1124_v39 = vadd.f32 %v1122_v33, %v1108_v60  ;;  %v1134_v30 = vadd.f32 %v1132_v53, %v1123_v25  ;;  %v1164_v41 = vmul.f32 0.004433048, %v1145_v57  ;;  %v1149_v45 = vmul.f32 0.24203622, %v1147_v26 }
 0x42b   : > { %v1157_v3 = vmul.f32 0.054005582, %v1145_v57  ;;  %vm1172_vm7 = vcmp.lt.s32.totalorder %v2022_v35, 18  ;;  %vm1193_vm8 = vcmp.lt.s32.totalorder %v2022_v35, 12 }
 0x42c   : > { %v1135_v61 = vadd.f32 %v1133_v50, %v1124_v39  ;;  %v1138_v28 = vadd.f32 %v1136_v8, %v1134_v30 }
 0x42e   : > { %v1150_v42 = vadd.f32 %v1148_v23, %v1138_v28  ;;  %v1139_v34 = vadd.f32 %v1137_v6, %v1135_v61 }
 0x430   : > { %v1158_v43 = vadd.f32 %v1156_v56, %v1150_v42  ;;  %v1151_v55 = vadd.f32 %v1149_v45, %v1139_v34 }
 0x432   : > { %v2669_v27 = vadd.f32 %v1164_v41, %v1158_v43  ;;  %v1159_v5 = vadd.f32 %v1157_v3, %v1151_v55 }
 0x434   : > { %1189 = vrot.lane.b32.xlu0 %v2669_v27, %s1748_s24  ;;  %1175 = vperm.xlu1 %1589, %v2669_v27   ;;  %v1167_v7 = vadd.f32 %v1164_v41, %v1159_v5  ;;  %v1211_v49 = vmul.f32 0.39905027, %v2669_v27 }
 0x436   : > { %v1212_v22 = vmul.f32 0.39905027, %v1167_v7 }
 0x438   : > { %1221 = vperm.xlu0 %1588, %v2669_v27   ;;  %1168 = vrot.lane.b32.xlu1 %v2669_v27, %s1749_s26 }
 0x439   : > { %1591 = vset.pattern.permute.xlu1 %v1739_v1 }
 0x43c   : > { %1590 = vset.pattern.permute.xlu0 %v1740_v2  ;;  %1200 = vrot.lane.b32.xlu1 %v2669_v27, %s1750_s27 }
 0x43d   : > { %1180 = vperm.xlu0 %1590, %v1167_v7  }
 0x440   : > { %1170 = vrot.lane.b32.xlu1 %v1167_v7, %s1749_s26 }
 0x441   : > { %1202 = vrot.lane.b32.xlu0 %v1167_v7, %s1750_s27 }
 0x442   : > { %1592 = vset.pattern.permute.xlu0 %v1739_v1 }
 0x444   : > { %1191 = vrot.lane.b32.xlu1 %v1167_v7, %s1748_s24 }
 0x445   : > { %1217 = vrot.lane.b32.xlu0 %v1167_v7, %s1751_s23 }
 0x448   : > { %1225 = vperm.xlu1 %1591, %v1167_v7  }
 0x449   : > { %1236 = vrot.lane.b32.xlu0 %v1167_v7, %s1752_s25 }
 0x44c   : > { %1215 = vrot.lane.b32.xlu1 %v2669_v27, %s1751_s23 }
 0x450   : > { %1234 = vrot.lane.b32.xlu1 %v2669_v27, %s1752_s25 }
 0x4a6   : > { %v1190_v46 = vpop.permute.xlu0 %1189 }
 0x4af   : > { %v1176_v2 = vpop.permute.xlu1 %1175 }
 0x4b0   : > { %v1194_v40 = vsel %vm1193_vm8, %v1176_v2, %v1190_v46 }
 0x4b1   : > { %v1196_v32 = vmul.f32 0.054005582, %v1194_v40 }
 0x4b3   : > { %v1222_v48 = vpop.permute.xlu0 %1221  ;;  %v1169_v20 = vpop.permute.xlu1 %1168 }
 0x4b4   : > { %v1183_v17 = vsel %vm1172_vm7, %v1176_v2, %v1169_v20  ;;  %v1252_v29 = vmul.f32 0.004433048, %v1222_v48 }
 0x4b5   : > { %v1185_v14 = vmul.f32 0.004433048, %v1183_v17 }
 0x4b7   : > { %v1201_v52 = vpop.permute.xlu1 %1200  ;;  %v1198_v60 = vadd.f32 %v1196_v32, %v1185_v14 }
 0x4b8   : > { %v1181_v44 = vpop.permute.xlu0 %1180  ;;  %v1205_v62 = vsel %vm1204_vm3, %v1176_v2, %v1201_v52 }
 0x4b9   : > { %v1207_v16 = vmul.f32 0.24203622, %v1205_v62 }
 0x4bb   : > { %v1171_v63 = vpop.permute.xlu1 %1170  ;;  %v1209_v47 = vadd.f32 %v1207_v16, %v1198_v60 }
 0x4bc   : > { %v1203_v1 = vpop.permute.xlu0 %1202  ;;  %v1184_v58 = vsel %vm1172_vm7, %v1181_v44, %v1171_v63 }
 0x4bd   : > { %v1206_v10 = vsel %vm1204_vm3, %v1181_v44, %v1203_v1  ;;  %v1186_v15 = vmul.f32 0.004433048, %v1184_v58  ;;  %v1213_v39 = vadd.f32 %v1211_v49, %v1209_v47 }
 0x4be   : > { %v1208_v37 = vmul.f32 0.24203622, %v1206_v10 }
 0x4bf   : > { %v1192_v36 = vpop.permute.xlu1 %1191 }
 0x4c0   : > { %v1195_v9 = vsel %vm1193_vm8, %v1181_v44, %v1192_v36  ;;  %v1218_v11 = vpop.permute.xlu0 %1217 }
 0x4c1   : > { %v1197_v51 = vmul.f32 0.054005582, %v1195_v9 }
 0x4c3   : > { %v1199_v13 = vadd.f32 %v1197_v51, %v1186_v15  ;;  %v1226_v54 = vpop.permute.xlu1 %1225 }
 0x4c4   : > { %v1229_v19 = vsel %vm1219_vm6, %v1226_v54, %v1218_v11  ;;  %v1237_v38 = vpop.permute.xlu0 %1236  ;;  %v1253_v53 = vmul.f32 0.004433048, %v1226_v54 }
 0x4c5   : > { %v1210_v21 = vadd.f32 %v1208_v37, %v1199_v13  ;;  %v1240_v12 = vsel %vm1238_vm11, %v1226_v54, %v1237_v38  ;;  %v1231_v4 = vmul.f32 0.24203622, %v1229_v19 }
 0x4c6   : > { %v1242_v33 = vmul.f32 0.054005582, %v1240_v12 }
 0x4c7   : > { %v1214_v24 = vadd.f32 %v1212_v22, %v1210_v21  ;;  %v1216_v25 = vpop.permute.xlu1 %1215 }
 0x4c8   : > { %v1228_v0 = vsel %vm1219_vm6, %v1222_v48, %v1216_v25 }
 0x4c9   : > { %v1233_v18 = vadd.f32 %v1231_v4, %v1214_v24  ;;  %v1230_v57 = vmul.f32 0.24203622, %v1228_v0 }
 0x4cb   : > { %v1244_v31 = vadd.f32 %v1242_v33, %v1233_v18  ;;  %v1235_v50 = vpop.permute.xlu1 %1234  ;;  %v1232_v59 = vadd.f32 %v1230_v57, %v1213_v39 }
 0x4cc   : > { %v1239_v8 = vsel %vm1238_vm11, %v1222_v48, %v1235_v50 }
 0x4cd   : > { %v1255_v30 = vadd.f32 %v1253_v53, %v1244_v31  ;;  %v1241_v61 = vmul.f32 0.054005582, %v1239_v8 }
 0x4cf   : > { %1257 = vst [vmem:[%s201_s7 + $0x8] sm:$0xff] %v1255_v30  ;;  %v1243_v28 = vadd.f32 %v1241_v61, %v1232_v59 }
 0x4d1   : > { %v1254_v35 = vadd.f32 %v1252_v29, %v1243_v28 }
 0x4d3   : > { %1256 = vst [vmem:[%s201_s7] sm:$0xff] %v1254_v35 }
 0x4d4   : > { %1678 = shalt.err (!%p1675_p4)
}
 0x4d5   : > { %s1679_s17 = scalar_lea.hbm %s2702_s30, 256  ;;  %s1683_s24 = scalar_lea.hbm %s2747_s2, 512 }
 0x4d6   : > { %p1680_p9 = scmp.ne.s32.totalorder %s2702_s30, %s1679_s17  ;;  %p1684_p5 = scmp.lt.s32.totalorder %s2702_s30, %s2747_s2 }
 0x4d7   : > { %p1685_p8 = scmp.lt.s32.totalorder %s1683_s24, %s1679_s17 }
 0x4d8   : > { %p1681_p11 = pnand %p1680_p9, %p2757_p1 }
 0x4d9   : > { %p1686_p6 = por %p1685_p8, %p1684_p5 }
 0x4da   : > { %p1682_p3 = pneg %p1681_p11 }
 0x4dc   : > { %p1687_p13 = pnand %p1686_p6, %p1682_p3 }
 0x4de   : > { %1690 = shalt.err (!%p1687_p13)
}
 0x4df   : > { %s1754_s23 = smov 128   ;;  %s1755_s25 = smov 8  }
 0x4e0   : > { %1403 = dma.vmem_to_hbm [thread:$0]  (%p2757_p1), %s2697_s8, 256, %s2702_s30, %s1259_s5, %s1754_s23, %s1754_s23, %s1755_s25  }
 0x4e1 PF: > { %s1287_s7 = sand.u32 1, %s1721_s9   ;;  %p2758_p12 = scmp.ne.s32.totalorder %s2753_s22, 0 }
 0x4e2   : > { %p2759_p7 = scmp.ge.s32.totalorder %s1733_s12, 2  ;;  %s1288_s4 = scalar_lea.sflag [#allocation4], %s1287_s7 }
 0x4e4   : > { %p1413_p10 = pnand %p2759_p7, %p2758_p12 }
 0x4e6   : > { %p1414_p0 = pneg %p1413_p10 }
 0x4e8   : > { %1716 = dma.done.wait (%p1414_p0), %s1288_s4, 256  }
 0x4e9   : > { %1718 = vsyncadd (%p1414_p0), %s1288_s4, 4294967040  ;;  %p18_p2 = scmp.ge.s32.totalorder %s1796_s15, 4   ;;  %s2760_s9 = smov %s1725_s10 }
 0x4ea   : > { %s2761_s10 = smov %s1729_s11  ;;  %s2762_s11 = smov %s1808_s18 }
 0x4eb   : > { %s2763_s12 = smov %s1796_s15  ;;  %20 = sbr.rel (!%p18_p2) target bundleno = 7 (0x7), region = 86 }
 0x4f0   :  { %1293 = vsyncpa [#allocation3], 1 }
 0x4f1   :  { %1295 = vsyncpa [#allocation3 + $0x1], 1 }
 0x4f2   :  { %1296 = vsyncpa [#allocation6], 1 }
 0x4f3   :  { %1298 = vsyncpa [#allocation6 + $0x1], 1 }
 0x4f4   :  { %1299 = vsyncpa [#allocation4], 1 }
 0x4f5   :  { %1301 = vsyncpa [#allocation4 + $0x1], 1 }

</bundles_post_ra>
